<compile_context>
chip_gen: v6e
topology: v6e:2x2x1
jax: 0.10.0
libtpu: 0.0.40
codegen_flags: <defaults>
</compile_context>

<pallas_src>
import jax
import jax.numpy as jnp
from jax.experimental import pallas as pl
from jax.experimental.pallas import tpu as pltpu

_K = 49          # the module hard-codes the 7x7 spatial grid
_OC_PAD = 128    # lane-dense output width


def _sigsoft_kernel(v_ref, qb_ref, wv_ref, bv_ref, wc_ref, o_ref):
    # v_ref  : (Bt*K, Dv)      bf16   flattened (batch*position) rows
    # qb_ref : (Bt*K, OC_PAD)  f32    hoisted q pathway (+ conv bias), row-expanded
    # wv_ref : (Dv, H)         bf16   v_proj Linear (weight_norm folded, transposed)
    # bv_ref : (1, H)          f32
    # wc_ref : (H, OC_PAD)     bf16   v-half of the 1x1 conv weight, lane-padded
    # o_ref  : (Bt*K, OC_PAD)  f32
    v_proj = jnp.maximum(
        jnp.dot(v_ref[...], wv_ref[...], preferred_element_type=jnp.float32)
        + bv_ref[...], 0.0)                                        # (Bt*K, H) f32
    logits = jnp.dot(v_proj.astype(wc_ref.dtype), wc_ref[...],
                     preferred_element_type=jnp.float32) + qb_ref[...]
    o_ref[...] = jax.nn.sigmoid(logits).astype(o_ref.dtype)


def sigsoft_attention(v, q, params, *, block_b=8, compute_dtype=jnp.bfloat16):
    """v: (B, K=49, v_dim), q: (B, q_dim) -> sigmoid attention weights (B, K, OC)."""
    B, K, Dv = v.shape
    assert K == _K, "module reshapes to 7x7, so K must be 49"
    wv_t, bv, wq_t, bq, wcv_t, wcq_t, bc = params
    H = wv_t.shape[1]
    OC = wcv_t.shape[1]
    assert OC <= _OC_PAD

    # ---- wrapper-side (XLA) prep -------------------------------------------
    # q pathway hoisted out of the kernel: one (B,Dq)x(Dq,H) and one (B,H)x(H,OC)
    # matmul over the whole batch; the result is a per-batch additive logit bias.
    q_proj = jnp.maximum(q @ wq_t + bq, 0.0)                       # (B, H)  f32
    q_bias = q_proj @ wcq_t + bc                                   # (B, OC) f32

    bt = max(1, min(block_b, B))
    n_blk = pl.cdiv(B, bt)
    b_pad = n_blk * bt

    # Flatten batch*K into the matmul M dim; pad batch to a multiple of bt.
    v_flat = v.reshape(B * K, Dv).astype(compute_dtype)            # (B*K, Dv)
    if b_pad != B:
        v_flat = jnp.pad(v_flat, ((0, (b_pad - B) * K), (0, 0)))
        q_bias = jnp.pad(q_bias, ((0, b_pad - B), (0, 0)))
    # Lane-dense output: pad OC -> 128; row-expand q_bias over the K positions.
    q_bias = jnp.pad(q_bias, ((0, 0), (0, _OC_PAD - OC)))
    q_bias = jnp.repeat(q_bias, K, axis=0)                         # (b_pad*K, 128)

    wv_c = wv_t.astype(compute_dtype)                              # (Dv, H)
    bv_c = bv.astype(jnp.float32).reshape(1, H)                    # (1, H)
    wc_c = jnp.pad(wcv_t, ((0, 0), (0, _OC_PAD - OC))).astype(compute_dtype)

    rows = bt * K                                                  # 392 for bt=8
    full = lambda shape: pl.BlockSpec(shape, lambda i: (0,) * len(shape))

    out = pl.pallas_call(
        _sigsoft_kernel,
        out_shape=jax.ShapeDtypeStruct((b_pad * K, _OC_PAD), jnp.float32),
        grid_spec=pltpu.PrefetchScalarGridSpec(
            num_scalar_prefetch=0,
            grid=(n_blk,),
            in_specs=[
                pl.BlockSpec((rows, Dv), lambda i: (i, 0)),        # v rows
                pl.BlockSpec((rows, _OC_PAD), lambda i: (i, 0)),   # q-bias rows
                full((Dv, H)),                                     # Wv^T
                full((1, H)),                                      # bv
                full((H, _OC_PAD)),                                # Wc_v^T (padded)
            ],
            out_specs=pl.BlockSpec((rows, _OC_PAD), lambda i: (i, 0)),
        ),
        compiler_params=pltpu.CompilerParams(
            dimension_semantics=("parallel",)),                    # megacore-shardable
    )(v_flat, q_bias, wv_c, bv_c, wc_c)

    # Drop batch padding and the sigmoid(0)=0.5 padded output columns.
    return out.reshape(b_pad, K, _OC_PAD)[:B, :, :OC]


def _reference(v, q, params, compute_dtype=jnp.bfloat16):
    """Pure-JAX reference following the same bf16-input / f32-accumulate path."""
    wv_t, bv, wq_t, bq, wcv_t, wcq_t, bc = params
    v_proj = jnp.maximum(
        jnp.dot(v.astype(compute_dtype), wv_t.astype(compute_dtype),
                preferred_element_type=jnp.float32) + bv, 0.0)     # (B, K, H)
    q_proj = jnp.maximum(q @ wq_t + bq, 0.0)                       # (B, H)
    q_bias = q_proj @ wcq_t + bc                                   # (B, OC)
    logits = jnp.dot(v_proj.astype(compute_dtype), wcv_t.astype(compute_dtype),
                     preferred_element_type=jnp.float32) + q_bias[:, None, :]
    return jax.nn.sigmoid(logits)


if __name__ == "__main__":
    # Small shapes consistent with the module: K = 49 (7x7) is required.
    # B=16 with block_b=8 gives a 2-step parallel grid (exercises the batch tiling).
    B, K, Dv, Dq, H, OC = 16, 49, 32, 16, 32, 36

    key = jax.random.PRNGKey(0)
    ks = jax.random.split(key, 8)

    v = jax.random.normal(ks[0], (B, K, Dv), jnp.float32)
    q = jax.random.normal(ks[1], (B, Dq), jnp.float32)

    # Deterministic synthetic parameters (weight_norm pre-folded; weights
    # stored pre-transposed for channels-last matmuls).
    wv_t = jax.random.normal(ks[2], (Dv, H), jnp.float32) * 0.1   # v_proj Linear
    bv = jnp.zeros((1, H), jnp.float32)
    wq_t = jax.random.normal(ks[3], (Dq, H), jnp.float32) * 0.1   # q_proj Linear
    bq = jnp.zeros((1, H), jnp.float32)
    # conv1: Conv2d(2H -> OC, 1x1) weight (OC, 2H, 1, 1); split into v / q halves.
    wc = jax.random.normal(ks[4], (OC, 2 * H), jnp.float32) * 0.1
    wcv_t = wc[:, :H].T                                            # (H, OC)
    wcq_t = wc[:, H:].T                                            # (H, OC)
    bc = jax.random.normal(ks[5], (1, OC), jnp.float32) * 0.1

    params = (wv_t, bv, wq_t, bq, wcv_t, wcq_t, bc)

    out = sigsoft_attention(v, q, params, block_b=8)
    out = jax.block_until_ready(out)

    ref = _reference(v, q, params)
    assert out.shape == (B, K, OC)
    assert jnp.allclose(out, ref, atol=2e-3, rtol=0), float(jnp.max(jnp.abs(out - ref)))

    print("KERNEL_OK")
</pallas_src>

<mosaic_0001>
module attributes {stable_mosaic.version = 11 : i64} {
  func.func @_sigsoft_kernel(%arg0: i32, %arg1: memref<392x32xbf16, #tpu.memory_space<vmem>>, %arg2: memref<392x128xf32, #tpu.memory_space<vmem>>, %arg3: memref<32x32xbf16, #tpu.memory_space<vmem>>, %arg4: memref<1x32xf32, #tpu.memory_space<vmem>>, %arg5: memref<32x128xbf16, #tpu.memory_space<vmem>>, %arg6: memref<392x128xf32, #tpu.memory_space<vmem>>) attributes {dimension_semantics = [#tpu.dimension_semantics<parallel>], iteration_bounds = array<i64: 2>, scalar_prefetch = 0 : i64, scratch_operands = 0 : i64, tpu.core_type = #tpu.core_type<tc>, window_params = [{transform_indices = @transform_0, window_bounds = array<i64: 392, 32>}, {transform_indices = @transform_1, window_bounds = array<i64: 392, 128>}, {pipeline_mode = #tpu.pipeline_mode<synchronous>, transform_indices = @transform_2, window_bounds = array<i64: 32, 32>}, {pipeline_mode = #tpu.pipeline_mode<synchronous>, transform_indices = @transform_3, window_bounds = array<i64: 1, 32>}, {pipeline_mode = #tpu.pipeline_mode<synchronous>, transform_indices = @transform_4, window_bounds = array<i64: 32, 128>}, {transform_indices = @transform_5, window_bounds = array<i64: 392, 128>}]} {
    %c0 = arith.constant 0 : index
    %c0_0 = arith.constant 0 : index
    %0 = vector.load %arg1[%c0, %c0_0] : memref<392x32xbf16, #tpu.memory_space<vmem>>, vector<392x32xbf16>
    %c0_1 = arith.constant 0 : index
    %c0_2 = arith.constant 0 : index
    %1 = vector.load %arg3[%c0_1, %c0_2] : memref<32x32xbf16, #tpu.memory_space<vmem>>, vector<32x32xbf16>
    %cst = arith.constant dense<0.000000e+00> : vector<392x32xf32>
    %2 = tpu.matmul %0, %1, %cst {dimension_numbers = #tpu.dot_dimension_numbers<[1], [0], [0], [1], [0, 0, 1, 1], [], []>} : vector<392x32xbf16>, vector<32x32xbf16>, vector<392x32xf32> -> vector<392x32xf32>
    %c0_3 = arith.constant 0 : index
    %c0_4 = arith.constant 0 : index
    %3 = vector.load %arg4[%c0_3, %c0_4] : memref<1x32xf32, #tpu.memory_space<vmem>>, vector<1x32xf32>
    %4 = vector.broadcast %3 : vector<1x32xf32> to vector<392x32xf32>
    %5 = arith.addf %2, %4 : vector<392x32xf32>
    %cst_5 = arith.constant 0.000000e+00 : f32
    %6 = vector.broadcast %cst_5 : f32 to vector<392x32xf32>
    %7 = arith.maximumf %5, %6 : vector<392x32xf32>
    %8 = arith.truncf %7 : vector<392x32xf32> to vector<392x32xbf16>
    %c0_6 = arith.constant 0 : index
    %c0_7 = arith.constant 0 : index
    %9 = vector.load %arg5[%c0_6, %c0_7] : memref<32x128xbf16, #tpu.memory_space<vmem>>, vector<32x128xbf16>
    %cst_8 = arith.constant dense<0.000000e+00> : vector<392x128xf32>
    %10 = tpu.matmul %8, %9, %cst_8 {dimension_numbers = #tpu.dot_dimension_numbers<[1], [0], [0], [1], [0, 0, 1, 1], [], []>} : vector<392x32xbf16>, vector<32x128xbf16>, vector<392x128xf32> -> vector<392x128xf32>
    %c0_9 = arith.constant 0 : index
    %c0_10 = arith.constant 0 : index
    %11 = vector.load %arg2[%c0_9, %c0_10] : memref<392x128xf32, #tpu.memory_space<vmem>>, vector<392x128xf32>
    %12 = arith.addf %10, %11 : vector<392x128xf32>
    %13 = arith.negf %12 : vector<392x128xf32>
    %14 = math.exp %13 : vector<392x128xf32>
    %cst_11 = arith.constant 1.000000e+00 : f32
    %15 = vector.broadcast %cst_11 : f32 to vector<392x128xf32>
    %16 = arith.addf %15, %14 : vector<392x128xf32>
    %17 = arith.divf %15, %16 : vector<392x128xf32>
    %c0_12 = arith.constant 0 : index
    %c0_13 = arith.constant 0 : index
    %18 = vector.load %arg6[%c0_12, %c0_13] : memref<392x128xf32, #tpu.memory_space<vmem>>, vector<392x128xf32>
    tpu.vector_store %arg6[%c0_12, %c0_13], %17 {strides = array<i32>} : memref<392x128xf32, #tpu.memory_space<vmem>>, vector<392x128xf32>,
    return
  }
  func.func @transform_0(%arg0: i32) -> (i32, i32) {
    %c0_i32 = arith.constant 0 : i32
    %c0_i32_0 = arith.constant 0 : i32
    return %arg0, %c0_i32 : i32, i32
  }
  func.func @transform_1(%arg0: i32) -> (i32, i32) {
    %c0_i32 = arith.constant 0 : i32
    %c0_i32_0 = arith.constant 0 : i32
    return %arg0, %c0_i32 : i32, i32
  }
  func.func @transform_2(%arg0: i32) -> (i32, i32) {
    %c0_i32 = arith.constant 0 : i32
    %c0_i32_0 = arith.constant 0 : i32
    %c0_i32_1 = arith.constant 0 : i32
    return %c0_i32, %c0_i32_0 : i32, i32
  }
  func.func @transform_3(%arg0: i32) -> (i32, i32) {
    %c0_i32 = arith.constant 0 : i32
    %c0_i32_0 = arith.constant 0 : i32
    %c0_i32_1 = arith.constant 0 : i32
    return %c0_i32, %c0_i32_0 : i32, i32
  }
  func.func @transform_4(%arg0: i32) -> (i32, i32) {
    %c0_i32 = arith.constant 0 : i32
    %c0_i32_0 = arith.constant 0 : i32
    %c0_i32_1 = arith.constant 0 : i32
    return %c0_i32, %c0_i32_0 : i32, i32
  }
  func.func @transform_5(%arg0: i32) -> (i32, i32) {
    %c0_i32 = arith.constant 0 : i32
    %c0_i32_0 = arith.constant 0 : i32
    return %arg0, %c0_i32 : i32, i32
  }
}

</mosaic_0001>

<bundles_post_ra>
// kernel: tpu_custom_call.1
= control target key start
LH: loop header
LB: loop body
LE: loop exit
PB: predicated region body
PF: predicated region fallthrough
CT: control target
= control target key end

     0   :  { %10 = vsyncpa [#allocation3], 0  ;;  %s2978_s0 = inlined_call_operand.vmem [shape: bf16[784,32], index: 0, kind: input, shape index: {}]   ;;  %s2979_s1 = inlined_call_operand.hbm [shape: f32[784,128], index: 1, kind: input, shape index: {}]   ;;  %s2980_s2 = inlined_call_operand.vmem [shape: bf16[32,32], index: 2, kind: input, shape index: {}]   ;;  %s2981_s3 = inlined_call_operand.vmem [shape: f32[1,32], index: 3, kind: input, shape index: {}]   ;;  %s2982_s4 = inlined_call_operand.vmem [shape: bf16[32,128], index: 4, kind: input, shape index: {}]   ;;  %s2983_s5 = inlined_call_operand.hbm [shape: f32[784,128], index: 5, kind: output, shape index: {}]  }
   0x1   :  { %12 = vsyncpa [#allocation3 + $0x1], 0 }
   0x2   :  { %13 = vsyncpa [#allocation4], 0 }
   0x3   :  { %15 = vsyncpa [#allocation4 + $0x1], 0  ;;  %s2472_s18 = smov 0   ;;  %s2474_s19 = smov 0  }
   0x4   :  { %s2476_s20 = smov 0   ;;  %s2478_s21 = smov 0  }
   0x5 LB: > { %s2493_s22 = sadd.s32 4294967295, %s2432_s21   ;;  %s1659_s23 = sadd.s32 4294967294, %s2432_s21   ;;  %s2432_s21 = sphi %s2478_s21, %s2997_s21   ;;  %s2428_s20 = sphi %s2476_s20, %s2996_s20   ;;  %s2424_s19 = sphi %s2474_s19, %s2995_s19   ;;  %s2420_s18 = sphi %s2472_s18, %s2994_s18  }
   0x6   : > { %s2497_s24 = sadd.s32 1, %s2432_s21   ;;  %s54_s25 = sadd.s32 1, %s2428_s20 }
   0x7   : > { %s51_s26 = ssub.s32 %s2432_s21, %s2497_s24  ;;  %p61_p0 = scmp.ne.s32.totalorder %s2428_s20, %s2424_s19 }
   0x8   : > { %p52_p1 = scmp.eq.s32.totalorder %s51_s26, 0  ;;  %p62_p2 = scmp.eq.s32.totalorder %s2432_s21, 0 }
   0x9   : > { %p67_p3 = scmp.ne.s32.totalorder %s2424_s19, %s2420_s18  ;;  %p68_p4 = scmp.eq.s32.totalorder %s2493_s22, 0 }
   0xa   : > { %s2509_s27 = scalar_select %p52_p1, %s2428_s20, %s54_s25  }
   0xb   : > { %p63_p5 = por %p62_p2, %p61_p0  ;;  %p2511_p6 = por %p68_p4, %p67_p3 }
   0xc   : > { %p154_p7 = scmp.eq.s32.totalorder %s2493_s22, 1  ;;  %p160_p8 = scmp.eq.s32.totalorder %s1659_s23, 1 }
   0xd   : > { %s2986_s28 = scalar_select %p2511_p6, 1, 0 }
   0xe   : > { %p2075_p10 = scmp.lt.s32.totalorder %s2432_s21, 2  ;;  %p2518_p11 = por %p154_p7, %p61_p0 }
   0xf   : > { %p2522_p12 = por %p160_p8, %p67_p3  ;;  %s198_s6 = sand.u32 1, %s2428_s20  }
  0x10   : > { %s2987_s29 = scalar_select %p2518_p11, 1, 0 }
  0x11   : > { %s2988_s30 = scalar_select %p2522_p12, 1, 0 }
  0x12   : > { %s1797_s7 = smul.u32 6272, %s2432_s21  ;;  %p2533_p13 = pnand %p2075_p10, %p63_p5 }
  0x13   : > { %s2061_s8 = smul.u32 392, %s198_s6  ;;  %s2539_s15 = scalar_lea.sflag [#allocation3], %s198_s6 }
  0x14   : > { %s2531_s11 = scalar_lea.hbm %s2979_s1, %s1797_s7  ;;  %p2342_p1 = pneg %p2533_p13 }
  0x15   : > { %s202_s13 = scalar_lea.vmem [#allocation2], %s2061_s8  ;;  %s2340_s16 = scalar_lea.hbm %s2531_s11, 6272 }
  0x16   : > { %s209_s14 = sshll.u32 %s202_s13, 4  ;;  %p2341_p0 = scmp.ne.s32.totalorder %s2531_s11, %s2340_s16  ;;  %s2537_s14 = int_to_ptr.vmem [resolvable:$true] %s209_s14 }
  0x17   : > { %s2345_s25 = scalar_lea.hbm %s2979_s1, 12544  ;;  %p2346_p4 = scmp.lt.s32.totalorder %s2531_s11, %s2979_s1 }
  0x18   : > { %p2343_p2 = pnand %p2342_p1, %p2341_p0  ;;  %p2347_p5 = scmp.lt.s32.totalorder %s2345_s25, %s2340_s16 }
  0x1a   : > { %p2344_p3 = pneg %p2343_p2  ;;  %p2348_p7 = por %p2347_p5, %p2346_p4 }
  0x1c   : > { %p2349_p8 = pnand %p2348_p7, %p2344_p3 }
  0x1e   : > { %2352 = shalt.err (!%p2349_p8)
}
  0x1f   : > { %s2353_s6 = scalar_lea.vmem %s2537_s14, 6272  ;;  %s2434_s8 = smov [#allocation2]  }
  0x20   : > { %p2354_p10 = scmp.ne.s32.totalorder %s2537_s14, %s2353_s6  ;;  %s2358_s9 = sshll.u32 %s2434_s8, 4  ;;  %s2359_s9 = int_to_ptr.vmem [resolvable:$false] %s2358_s9 }
  0x21   : > { %s2360_s10 = scalar_lea.vmem %s2359_s9, 12544  ;;  %p2361_p2 = scmp.lt.s32.totalorder %s2537_s14, %s2359_s9 }
  0x22   : > { %p2356_p9 = pnand %p2354_p10, %p2342_p1  ;;  %p2362_p12 = scmp.lt.s32.totalorder %s2360_s10, %s2353_s6 }
  0x24   : > { %p2357_p0 = pneg %p2356_p9  ;;  %p2363_p11 = por %p2362_p12, %p2361_p2 }
  0x26   : > { %p2364_p6 = pnand %p2363_p11, %p2357_p0 }
  0x28   : > { %2367 = shalt.err (!%p2364_p6)
}
  0x29   : > { %s2435_s13 = smov 128   ;;  %s2436_s16 = smov 8  }
  0x2a   : > { %2070 = dma.hbm_to_vmem [thread:$0]  (!%p2533_p13), %s2531_s11, 6272, %s2537_s14, %s2539_s15, %s2435_s13, %s2435_s13, %s2436_s16  }
  0x2b   : > { %p1663_p9 = scmp.ge.s32.totalorder %s2432_s21, 1  ;;  %p217_p1 = scmp.lt.s32.totalorder %s2432_s21, 3 }
  0x2d   : > { %p218_p3 = pnand %p1663_p9, %p217_p1 }
  0x2e   : > { %s2563_s17 = sand.u32 (!%p218_p3), 1, %s2424_s19   ;;  %p2990_p6 = scmp.ne.s32.totalorder (!%p218_p3), %s2986_s28, 0 }
  0x2f   : > { %221 = sbr.rel (%p218_p3) target bundleno = 699 (0x2bb), region = 40  ;;  %s224_s25 = scalar_lea.sflag (!%p218_p3), [#allocation3], %s2563_s17 }
  0x30   : > { %s2062_s23 = smul.u32 (!%p218_p3), 392, %s2563_s17 }
  0x32   : > { %s2569_s26 = scalar_lea.vmem (!%p218_p3), [#allocation2], %s2062_s23 }
  0x34   : > { %2411 = dma.done.wait (%p2990_p6), %s224_s25, 6272  }
  0x35   : > { %2413 = vsyncadd (%p2990_p6), %s224_s25, 4294961024  ;;  %s259_s11 = smul.u32 49, %s2493_s22  ;;  %v2437_v0 = vmov 0.0   ;;  %vm2438_vm0 = vmmov 0   ;;  %v2115_v1 = vld [vmem:[%s2980_s2 + $0x8] sm:$0xff]   ;;  %v2116_v2 = vld [vmem:[%s2980_s2] sm:$0xff]  }
  0x36   : > { %1853 = vmatprep.subr.bf16.mxu0 %v2437_v0  ;;  %1857 = vmatprep.mubr.msk.bf16.mxu0 %vm2438_vm0, %v2437_v0  ;;  %vm463_vm1 = vcmask 261120   ;;  %v2142_v12 = vld [vmem:[%s2982_s4 + $0x8] sm:$0xff]   ;;  %v2143_v14 = vld [vmem:[%s2982_s4] sm:$0xff]   ;;  %s2838_s14 = scalar_lea.vmem [#allocation5], %s2062_s23  ;;  %s1798_s23 = smul.u32 6272, %s2493_s22 }
  0x37   : > { %p260_p11 = scmp.lt.s32.totalorder %s259_s11, 97  ;;  %1957 = vmatprep.subr.bf16.mxu1 %v2437_v0  ;;  %1961 = vmatprep.mubr.msk.bf16.mxu1 %vm2438_vm0, %v2437_v0  ;;  %v2701_v30 = vld [vmem:[%s2981_s3] ss:$0 sm:$0xff]  ;;  %p2991_p13 = scmp.ne.s32.totalorder %s2987_s29, 0 }
  0x38   : > { %1854 = vmatpush3.bf16.msra.mxu0 %v2115_v1  ;;  %1958 = vmatpush3.bf16.msra.mxu1 %v2142_v12  ;;  %s2932_s7 = scalar_lea.hbm %s2983_s5, %s1798_s23  ;;  %s2439_s22 = smov [#allocation5]  }
  0x39   : > { %s2999_s11 = smov (!%p260_p11, %s259_s11), 97  ;;  %1855 = vmatprep.subr.bf16.mxu0 %v2437_v0  ;;  %1959 = vmatprep.subr.bf16.mxu1 %v2437_v0  ;;  %s2372_s9 = sshll.u32 %s2439_s22, 4  ;;  %s2373_s9 = int_to_ptr.vmem [resolvable:$false] %s2372_s9 }
  0x3a   : > { %s1664_s12 = sshll.u32 %s2999_s11, 2  ;;  %s2374_s10 = scalar_lea.vmem %s2373_s9, 12544 }
  0x3b   : > { %s2588_s6 = scalar_lea.vmem %s2978_s0, %s1664_s12 }
  0x3c   : > { %v2117_v3 = vld [vmem:[%s2588_s6] sm:$0xff]   ;;  %1856 = vmatpush3.bf16.msra.mxu0 %v2116_v2  ;;  %v2118_v4 = vld [vmem:[%s2588_s6 + $0x8] sm:$0xff]   ;;  %v2119_v5 = vld [vmem:[%s2588_s6 + $0x10] sm:$0xff]   ;;  %1960 = vmatpush3.bf16.msra.mxu1 %v2143_v14 }
  0x3d   : > { %v2120_v6 = vld [vmem:[%s2588_s6 + $0x18] sm:$0xff]   ;;  %v2121_v7 = vld [vmem:[%s2588_s6 + $0x20] sm:$0xff]   ;;  %v2122_v8 = vld [vmem:[%s2588_s6 + $0x28] sm:$0xff]  }
  0x3e   : > { %v2123_v9 = vld [vmem:[%s2588_s6 + $0x30] sm:$0xff]   ;;  %v2124_v10 = vld [vmem:[%s2588_s6 + $0x38] sm:$0xff]   ;;  %v2125_v11 = vld [vmem:[%s2588_s6 + $0x40] sm:$0xff]  }
  0x3f   : > { %1858 = vmatmul.mubr.msk.bf16.vlgmr.msra.gmra.mxu0 %vm463_vm1, %v2117_v3  ;;  %v2126_v13 = vld [vmem:[%s2588_s6 + $0x48] sm:$0xff]   ;;  %v2127_v15 = vld [vmem:[%s2588_s6 + $0x50] sm:$0xff]   ;;  %v2128_v16 = vld [vmem:[%s2588_s6 + $0x58] sm:$0xff]  }
  0x40   : > { %1861 = vmatprep.mubr.msk.bf16.mxu0 %vm2438_vm0, %v2437_v0  ;;  %v2129_v17 = vld [vmem:[%s2588_s6 + $0x60] sm:$0xff]   ;;  %v2130_v18 = vld [vmem:[%s2588_s6 + $0x68] sm:$0xff]   ;;  %v2131_v19 = vld [vmem:[%s2588_s6 + $0x70] sm:$0xff]  }
  0x41   : > { %v2132_v20 = vld [vmem:[%s2588_s6 + $0x78] sm:$0xff]   ;;  %v2133_v21 = vld [vmem:[%s2588_s6 + $0x80] sm:$0xff]   ;;  %v2134_v22 = vld [vmem:[%s2588_s6 + $0x88] sm:$0xff]  }
  0x42   : > { %v2135_v23 = vld [vmem:[%s2588_s6 + $0x90] sm:$0xff]   ;;  %v2136_v24 = vld [vmem:[%s2588_s6 + $0x98] sm:$0xff]   ;;  %v2137_v25 = vld [vmem:[%s2588_s6 + $0xa0] sm:$0xff]  }
  0x43   : > { %v2138_v26 = vld [vmem:[%s2588_s6 + $0xa8] sm:$0xff]   ;;  %v2139_v27 = vld [vmem:[%s2588_s6 + $0xb0] sm:$0xff]   ;;  %v2140_v28 = vld [vmem:[%s2588_s6 + $0xb8] sm:$0xff]  }
  0x44   : > { %v2141_v29 = vld [vmem:[%s2588_s6 + $0xc0] ss:$0 sps:$4 sm:$0xff]   ;;  %s1561_s6 = scalar_lea.sflag [#allocation4], %s2563_s17 }
  0x47   : > { %1862 = vmatmul.mubr.msk.bf16.gmra.mxu0 %vm463_vm1, %v2118_v4 }
  0x48   : > { %1865 = vmatprep.mubr.msk.bf16.mxu0 %vm2438_vm0, %v2437_v0 }
  0x4f   : > { %1866 = vmatmul.mubr.msk.bf16.gmra.mxu0 %vm463_vm1, %v2119_v5 }
  0x50   : > { %1869 = vmatprep.mubr.msk.bf16.mxu0 %vm2438_vm0, %v2437_v0 }
  0x57   : > { %1870 = vmatmul.mubr.msk.bf16.gmra.mxu0 %vm463_vm1, %v2120_v6 }
  0x58   : > { %1873 = vmatprep.mubr.msk.bf16.mxu0 %vm2438_vm0, %v2437_v0 }
  0x5f   : > { %1874 = vmatmul.mubr.msk.bf16.gmra.mxu0 %vm463_vm1, %v2121_v7 }
  0x60   : > { %1877 = vmatprep.mubr.msk.bf16.mxu0 %vm2438_vm0, %v2437_v0 }
  0x67   : > { %1878 = vmatmul.mubr.msk.bf16.gmra.mxu0 %vm463_vm1, %v2122_v8 }
  0x68   : > { %1881 = vmatprep.mubr.msk.bf16.mxu0 %vm2438_vm0, %v2437_v0 }
  0x6f   : > { %1882 = vmatmul.mubr.msk.bf16.gmra.mxu0 %vm463_vm1, %v2123_v9 }
  0x70   : > { %1885 = vmatprep.mubr.msk.bf16.mxu0 %vm2438_vm0, %v2437_v0 }
  0x77   : > { %1886 = vmatmul.mubr.msk.bf16.gmra.mxu0 %vm463_vm1, %v2124_v10 }
  0x78   : > { %1889 = vmatprep.mubr.msk.bf16.mxu0 %vm2438_vm0, %v2437_v0 }
  0x7f   : > { %1890 = vmatmul.mubr.msk.bf16.gmra.mxu0 %vm463_vm1, %v2125_v11 }
  0x80   : > { %1893 = vmatprep.mubr.msk.bf16.mxu0 %vm2438_vm0, %v2437_v0 }
  0x87   : > { %1894 = vmatmul.mubr.msk.bf16.gmra.mxu0 %vm463_vm1, %v2126_v13 }
  0x88   : > { %1897 = vmatprep.mubr.msk.bf16.mxu0 %vm2438_vm0, %v2437_v0 }
  0x8f   : > { %1898 = vmatmul.mubr.msk.bf16.gmra.mxu0 %vm463_vm1, %v2127_v15 }
  0x90   : > { %1901 = vmatprep.mubr.msk.bf16.mxu0 %vm2438_vm0, %v2437_v0 }
  0x97   : > { %1902 = vmatmul.mubr.msk.bf16.gmra.mxu0 %vm463_vm1, %v2128_v16 }
  0x98   : > { %1905 = vmatprep.mubr.msk.bf16.mxu0 %vm2438_vm0, %v2437_v0 }
  0x9f   : > { %1906 = vmatmul.mubr.msk.bf16.gmra.mxu0 %vm463_vm1, %v2129_v17 }
  0xa0   : > { %1909 = vmatprep.mubr.msk.bf16.mxu0 %vm2438_vm0, %v2437_v0 }
  0xa7   : > { %1910 = vmatmul.mubr.msk.bf16.gmra.mxu0 %vm463_vm1, %v2130_v18 }
  0xa8   : > { %1913 = vmatprep.mubr.msk.bf16.mxu0 %vm2438_vm0, %v2437_v0 }
  0xaf   : > { %1914 = vmatmul.mubr.msk.bf16.gmra.mxu0 %vm463_vm1, %v2131_v19 }
  0xb0   : > { %1917 = vmatprep.mubr.msk.bf16.mxu0 %vm2438_vm0, %v2437_v0 }
  0xb7   : > { %1918 = vmatmul.mubr.msk.bf16.gmra.mxu0 %vm463_vm1, %v2132_v20 }
  0xb8   : > { %1921 = vmatprep.mubr.msk.bf16.mxu0 %vm2438_vm0, %v2437_v0 }
  0xbf   : > { %1922 = vmatmul.mubr.msk.bf16.gmra.mxu0 %vm463_vm1, %v2133_v21 }
  0xc0   : > { %1925 = vmatprep.mubr.msk.bf16.mxu0 %vm2438_vm0, %v2437_v0 }
  0xc7   : > { %1926 = vmatmul.mubr.msk.bf16.gmra.mxu0 %vm463_vm1, %v2134_v22 }
  0xc8   : > { %1929 = vmatprep.mubr.msk.bf16.mxu0 %vm2438_vm0, %v2437_v0 }
  0xcf   : > { %1930 = vmatmul.mubr.msk.bf16.gmra.mxu0 %vm463_vm1, %v2135_v23 }
  0xd0   : > { %1933 = vmatprep.mubr.msk.bf16.mxu0 %vm2438_vm0, %v2437_v0 }
  0xd7   : > { %1934 = vmatmul.mubr.msk.bf16.gmra.mxu0 %vm463_vm1, %v2136_v24 }
  0xd8   : > { %1937 = vmatprep.mubr.msk.bf16.mxu0 %vm2438_vm0, %v2437_v0 }
  0xdf   : > { %1938 = vmatmul.mubr.msk.bf16.gmra.mxu0 %vm463_vm1, %v2137_v25 }
  0xe0   : > { %1941 = vmatprep.mubr.msk.bf16.mxu0 %vm2438_vm0, %v2437_v0 }
  0xe7   : > { %1942 = vmatmul.mubr.msk.bf16.gmra.mxu0 %vm463_vm1, %v2138_v26 }
  0xe8   : > { %1945 = vmatprep.mubr.msk.bf16.mxu0 %vm2438_vm0, %v2437_v0 }
  0xef   : > { %1946 = vmatmul.mubr.msk.bf16.gmra.mxu0 %vm463_vm1, %v2139_v27 }
  0xf0   : > { %1949 = vmatprep.mubr.msk.bf16.mxu0 %vm2438_vm0, %v2437_v0 }
  0xf7   : > { %1950 = vmatmul.mubr.msk.bf16.gmra.mxu0 %vm463_vm1, %v2140_v28 }
  0xf8   : > { %1953 = vmatprep.mubr.msk.bf16.mxu0 %vm2438_vm0, %v2437_v0 }
  0xff   : > { %v573_v31 = vpop.f32.mrf.mxu0  ;;  %1954 = vmatmul.mubr.msk.bf16.gmra.mxu0 %vm463_vm1, %v2141_v29 }
 0x100   : > { %v574_v33 = vadd.f32 %v2701_v30, %v573_v31 }
 0x101   : > { %v1859_v32 = vpop.f32.mrf.mxu0 }
 0x102   : > { %v771_v37 = vmax.f32 %v574_v33, 0.0 }
 0x103   : > { %v576_v34 = vpop.f32.mrf.mxu0 }
 0x104   : > { %v577_v35 = vadd.f32 %v2701_v30, %v576_v34 }
 0x105   : > { %v1860_v36 = vpop.f32.mrf.mxu0 }
 0x106   : > { %v772_v38 = vmax.f32 %v577_v35, 0.0 }
 0x107   : > { %v581_v39 = vpop.f32.mrf.mxu0 }
 0x108   : > { %v820_v40 = vpack.c.bf16 %v772_v38, %v771_v37  ;;  %v582_v42 = vadd.f32 %v2701_v30, %v581_v39 }
 0x109   : > { %v1863_v41 = vpop.f32.mrf.mxu0 }
 0x10a   : > { %1962 = vmatmul.mubr.msk.bf16.vlgmr.msra.gmra.mxu1 %vm463_vm1, %v820_v40  ;;  %v773_v46 = vmax.f32 %v582_v42, 0.0 }
 0x10b   : > { %v584_v43 = vpop.f32.mrf.mxu0  ;;  %1965 = vmatprep.mubr.msk.bf16.mxu1 %vm2438_vm0, %v2437_v0 }
 0x10c   : > { %v585_v44 = vadd.f32 %v2701_v30, %v584_v43 }
 0x10d   : > { %v1864_v45 = vpop.f32.mrf.mxu0 }
 0x10e   : > { %v774_v47 = vmax.f32 %v585_v44, 0.0 }
 0x10f   : > { %v589_v48 = vpop.f32.mrf.mxu0 }
 0x110   : > { %v821_v49 = vpack.c.bf16 %v774_v47, %v773_v46  ;;  %v590_v51 = vadd.f32 %v2701_v30, %v589_v48 }
 0x111   : > { %v1867_v50 = vpop.f32.mrf.mxu0 }
 0x112   : > { %1966 = vmatmul.mubr.msk.bf16.gmra.mxu1 %vm463_vm1, %v821_v49  ;;  %v775_v55 = vmax.f32 %v590_v51, 0.0 }
 0x113   : > { %v592_v52 = vpop.f32.mrf.mxu0  ;;  %1969 = vmatprep.mubr.msk.bf16.mxu1 %vm2438_vm0, %v2437_v0 }
 0x114   : > { %v593_v53 = vadd.f32 %v2701_v30, %v592_v52 }
 0x115   : > { %v1868_v54 = vpop.f32.mrf.mxu0 }
 0x116   : > { %v776_v56 = vmax.f32 %v593_v53, 0.0 }
 0x117   : > { %v597_v57 = vpop.f32.mrf.mxu0 }
 0x118   : > { %v822_v58 = vpack.c.bf16 %v776_v56, %v775_v55  ;;  %v598_v60 = vadd.f32 %v2701_v30, %v597_v57 }
 0x119   : > { %v1871_v59 = vpop.f32.mrf.mxu0 }
 0x11a   : > { %1970 = vmatmul.mubr.msk.bf16.gmra.mxu1 %vm463_vm1, %v822_v58  ;;  %v777_v1 = vmax.f32 %v598_v60, 0.0 }
 0x11b   : > { %v600_v61 = vpop.f32.mrf.mxu0  ;;  %1973 = vmatprep.mubr.msk.bf16.mxu1 %vm2438_vm0, %v2437_v0 }
 0x11c   : > { %v601_v62 = vadd.f32 %v2701_v30, %v600_v61 }
 0x11d   : > { %v1872_v63 = vpop.f32.mrf.mxu0 }
 0x11e   : > { %v778_v2 = vmax.f32 %v601_v62, 0.0 }
 0x11f   : > { %v605_v3 = vpop.f32.mrf.mxu0 }
 0x120   : > { %v823_v4 = vpack.c.bf16 %v778_v2, %v777_v1  ;;  %v606_v6 = vadd.f32 %v2701_v30, %v605_v3 }
 0x121   : > { %v1875_v5 = vpop.f32.mrf.mxu0 }
 0x122   : > { %1974 = vmatmul.mubr.msk.bf16.gmra.mxu1 %vm463_vm1, %v823_v4  ;;  %v779_v10 = vmax.f32 %v606_v6, 0.0 }
 0x123   : > { %v608_v7 = vpop.f32.mrf.mxu0  ;;  %1977 = vmatprep.mubr.msk.bf16.mxu1 %vm2438_vm0, %v2437_v0 }
 0x124   : > { %v609_v8 = vadd.f32 %v2701_v30, %v608_v7 }
 0x125   : > { %v1876_v9 = vpop.f32.mrf.mxu0 }
 0x126   : > { %v780_v11 = vmax.f32 %v609_v8, 0.0 }
 0x127   : > { %v613_v12 = vpop.f32.mrf.mxu0 }
 0x128   : > { %v824_v13 = vpack.c.bf16 %v780_v11, %v779_v10  ;;  %v614_v15 = vadd.f32 %v2701_v30, %v613_v12 }
 0x129   : > { %v1879_v14 = vpop.f32.mrf.mxu0 }
 0x12a   : > { %1978 = vmatmul.mubr.msk.bf16.gmra.mxu1 %vm463_vm1, %v824_v13  ;;  %v781_v19 = vmax.f32 %v614_v15, 0.0 }
 0x12b   : > { %v616_v16 = vpop.f32.mrf.mxu0  ;;  %1981 = vmatprep.mubr.msk.bf16.mxu1 %vm2438_vm0, %v2437_v0 }
 0x12c   : > { %v617_v17 = vadd.f32 %v2701_v30, %v616_v16 }
 0x12d   : > { %v1880_v18 = vpop.f32.mrf.mxu0 }
 0x12e   : > { %v782_v20 = vmax.f32 %v617_v17, 0.0 }
 0x12f   : > { %v621_v21 = vpop.f32.mrf.mxu0 }
 0x130   : > { %v825_v22 = vpack.c.bf16 %v782_v20, %v781_v19  ;;  %v622_v24 = vadd.f32 %v2701_v30, %v621_v21 }
 0x131   : > { %v1883_v23 = vpop.f32.mrf.mxu0 }
 0x132   : > { %1982 = vmatmul.mubr.msk.bf16.gmra.mxu1 %vm463_vm1, %v825_v22  ;;  %v783_v28 = vmax.f32 %v622_v24, 0.0 }
 0x133   : > { %v624_v25 = vpop.f32.mrf.mxu0  ;;  %1985 = vmatprep.mubr.msk.bf16.mxu1 %vm2438_vm0, %v2437_v0 }
 0x134   : > { %v625_v26 = vadd.f32 %v2701_v30, %v624_v25 }
 0x135   : > { %v1884_v27 = vpop.f32.mrf.mxu0 }
 0x136   : > { %v784_v29 = vmax.f32 %v625_v26, 0.0 }
 0x137   : > { %v629_v31 = vpop.f32.mrf.mxu0 }
 0x138   : > { %v826_v32 = vpack.c.bf16 %v784_v29, %v783_v28  ;;  %v630_v34 = vadd.f32 %v2701_v30, %v629_v31 }
 0x139   : > { %v1887_v33 = vpop.f32.mrf.mxu0 }
 0x13a   : > { %1986 = vmatmul.mubr.msk.bf16.gmra.mxu1 %vm463_vm1, %v826_v32  ;;  %v785_v38 = vmax.f32 %v630_v34, 0.0 }
 0x13b   : > { %v632_v35 = vpop.f32.mrf.mxu0  ;;  %1989 = vmatprep.mubr.msk.bf16.mxu1 %vm2438_vm0, %v2437_v0 }
 0x13c   : > { %v633_v36 = vadd.f32 %v2701_v30, %v632_v35 }
 0x13d   : > { %v1888_v37 = vpop.f32.mrf.mxu0 }
 0x13e   : > { %v786_v39 = vmax.f32 %v633_v36, 0.0 }
 0x13f   : > { %v637_v40 = vpop.f32.mrf.mxu0 }
 0x140   : > { %v827_v41 = vpack.c.bf16 %v786_v39, %v785_v38  ;;  %v638_v43 = vadd.f32 %v2701_v30, %v637_v40 }
 0x141   : > { %v1891_v42 = vpop.f32.mrf.mxu0 }
 0x142   : > { %1990 = vmatmul.mubr.msk.bf16.gmra.mxu1 %vm463_vm1, %v827_v41  ;;  %v787_v47 = vmax.f32 %v638_v43, 0.0 }
 0x143   : > { %v640_v44 = vpop.f32.mrf.mxu0  ;;  %1993 = vmatprep.mubr.msk.bf16.mxu1 %vm2438_vm0, %v2437_v0 }
 0x144   : > { %v641_v45 = vadd.f32 %v2701_v30, %v640_v44 }
 0x145   : > { %v1892_v46 = vpop.f32.mrf.mxu0 }
 0x146   : > { %v788_v48 = vmax.f32 %v641_v45, 0.0 }
 0x147   : > { %v645_v49 = vpop.f32.mrf.mxu0 }
 0x148   : > { %v828_v50 = vpack.c.bf16 %v788_v48, %v787_v47  ;;  %v646_v52 = vadd.f32 %v2701_v30, %v645_v49 }
 0x149   : > { %v1895_v51 = vpop.f32.mrf.mxu0 }
 0x14a   : > { %1994 = vmatmul.mubr.msk.bf16.gmra.mxu1 %vm463_vm1, %v828_v50  ;;  %v789_v56 = vmax.f32 %v646_v52, 0.0 }
 0x14b   : > { %v648_v53 = vpop.f32.mrf.mxu0  ;;  %1997 = vmatprep.mubr.msk.bf16.mxu1 %vm2438_vm0, %v2437_v0 }
 0x14c   : > { %v649_v54 = vadd.f32 %v2701_v30, %v648_v53 }
 0x14d   : > { %v1896_v55 = vpop.f32.mrf.mxu0 }
 0x14e   : > { %v790_v57 = vmax.f32 %v649_v54, 0.0 }
 0x14f   : > { %v653_v58 = vpop.f32.mrf.mxu0 }
 0x150   : > { %v829_v59 = vpack.c.bf16 %v790_v57, %v789_v56  ;;  %v654_v61 = vadd.f32 %v2701_v30, %v653_v58 }
 0x151   : > { %v1899_v60 = vpop.f32.mrf.mxu0 }
 0x152   : > { %1998 = vmatmul.mubr.msk.bf16.gmra.mxu1 %vm463_vm1, %v829_v59  ;;  %v791_v2 = vmax.f32 %v654_v61, 0.0 }
 0x153   : > { %v656_v62 = vpop.f32.mrf.mxu0  ;;  %2001 = vmatprep.mubr.msk.bf16.mxu1 %vm2438_vm0, %v2437_v0 }
 0x154   : > { %v657_v63 = vadd.f32 %v2701_v30, %v656_v62 }
 0x155   : > { %v1900_v1 = vpop.f32.mrf.mxu0 }
 0x156   : > { %v792_v3 = vmax.f32 %v657_v63, 0.0 }
 0x157   : > { %v661_v4 = vpop.f32.mrf.mxu0 }
 0x158   : > { %v830_v5 = vpack.c.bf16 %v792_v3, %v791_v2  ;;  %v662_v7 = vadd.f32 %v2701_v30, %v661_v4 }
 0x159   : > { %v1903_v6 = vpop.f32.mrf.mxu0 }
 0x15a   : > { %2002 = vmatmul.mubr.msk.bf16.gmra.mxu1 %vm463_vm1, %v830_v5  ;;  %v793_v11 = vmax.f32 %v662_v7, 0.0 }
 0x15b   : > { %v664_v8 = vpop.f32.mrf.mxu0  ;;  %2005 = vmatprep.mubr.msk.bf16.mxu1 %vm2438_vm0, %v2437_v0 }
 0x15c   : > { %v665_v9 = vadd.f32 %v2701_v30, %v664_v8 }
 0x15d   : > { %v1904_v10 = vpop.f32.mrf.mxu0 }
 0x15e   : > { %v794_v12 = vmax.f32 %v665_v9, 0.0 }
 0x15f   : > { %v669_v13 = vpop.f32.mrf.mxu0 }
 0x160   : > { %v831_v14 = vpack.c.bf16 %v794_v12, %v793_v11  ;;  %v670_v16 = vadd.f32 %v2701_v30, %v669_v13 }
 0x161   : > { %v1907_v15 = vpop.f32.mrf.mxu0 }
 0x162   : > { %2006 = vmatmul.mubr.msk.bf16.gmra.mxu1 %vm463_vm1, %v831_v14  ;;  %v795_v20 = vmax.f32 %v670_v16, 0.0 }
 0x163   : > { %v672_v17 = vpop.f32.mrf.mxu0  ;;  %2009 = vmatprep.mubr.msk.bf16.mxu1 %vm2438_vm0, %v2437_v0 }
 0x164   : > { %v673_v18 = vadd.f32 %v2701_v30, %v672_v17 }
 0x165   : > { %v1908_v19 = vpop.f32.mrf.mxu0 }
 0x166   : > { %v796_v21 = vmax.f32 %v673_v18, 0.0 }
 0x167   : > { %v677_v22 = vpop.f32.mrf.mxu0 }
 0x168   : > { %v832_v23 = vpack.c.bf16 %v796_v21, %v795_v20  ;;  %v678_v25 = vadd.f32 %v2701_v30, %v677_v22 }
 0x169   : > { %v1911_v24 = vpop.f32.mrf.mxu0 }
 0x16a   : > { %2010 = vmatmul.mubr.msk.bf16.gmra.mxu1 %vm463_vm1, %v832_v23  ;;  %v797_v29 = vmax.f32 %v678_v25, 0.0 }
 0x16b   : > { %v680_v26 = vpop.f32.mrf.mxu0  ;;  %2013 = vmatprep.mubr.msk.bf16.mxu1 %vm2438_vm0, %v2437_v0 }
 0x16c   : > { %v681_v27 = vadd.f32 %v2701_v30, %v680_v26 }
 0x16d   : > { %v1912_v28 = vpop.f32.mrf.mxu0 }
 0x16e   : > { %v798_v31 = vmax.f32 %v681_v27, 0.0 }
 0x16f   : > { %v685_v32 = vpop.f32.mrf.mxu0 }
 0x170   : > { %v833_v33 = vpack.c.bf16 %v798_v31, %v797_v29  ;;  %v686_v35 = vadd.f32 %v2701_v30, %v685_v32 }
 0x171   : > { %v1915_v34 = vpop.f32.mrf.mxu0 }
 0x172   : > { %2014 = vmatmul.mubr.msk.bf16.gmra.mxu1 %vm463_vm1, %v833_v33  ;;  %v799_v39 = vmax.f32 %v686_v35, 0.0 }
 0x173   : > { %v688_v36 = vpop.f32.mrf.mxu0  ;;  %2017 = vmatprep.mubr.msk.bf16.mxu1 %vm2438_vm0, %v2437_v0 }
 0x174   : > { %v689_v37 = vadd.f32 %v2701_v30, %v688_v36 }
 0x175   : > { %v1916_v38 = vpop.f32.mrf.mxu0 }
 0x176   : > { %v800_v40 = vmax.f32 %v689_v37, 0.0 }
 0x177   : > { %v693_v41 = vpop.f32.mrf.mxu0 }
 0x178   : > { %v834_v42 = vpack.c.bf16 %v800_v40, %v799_v39  ;;  %v694_v44 = vadd.f32 %v2701_v30, %v693_v41 }
 0x179   : > { %v1919_v43 = vpop.f32.mrf.mxu0 }
 0x17a   : > { %2018 = vmatmul.mubr.msk.bf16.gmra.mxu1 %vm463_vm1, %v834_v42  ;;  %v801_v48 = vmax.f32 %v694_v44, 0.0 }
 0x17b   : > { %v696_v45 = vpop.f32.mrf.mxu0  ;;  %2021 = vmatprep.mubr.msk.bf16.mxu1 %vm2438_vm0, %v2437_v0 }
 0x17c   : > { %v697_v46 = vadd.f32 %v2701_v30, %v696_v45 }
 0x17d   : > { %v1920_v47 = vpop.f32.mrf.mxu0 }
 0x17e   : > { %v802_v49 = vmax.f32 %v697_v46, 0.0 }
 0x17f   : > { %v701_v50 = vpop.f32.mrf.mxu0 }
 0x180   : > { %v835_v51 = vpack.c.bf16 %v802_v49, %v801_v48  ;;  %v702_v53 = vadd.f32 %v2701_v30, %v701_v50 }
 0x181   : > { %v1923_v52 = vpop.f32.mrf.mxu0 }
 0x182   : > { %2022 = vmatmul.mubr.msk.bf16.gmra.mxu1 %vm463_vm1, %v835_v51  ;;  %v803_v57 = vmax.f32 %v702_v53, 0.0 }
 0x183   : > { %v704_v54 = vpop.f32.mrf.mxu0  ;;  %2025 = vmatprep.mubr.msk.bf16.mxu1 %vm2438_vm0, %v2437_v0 }
 0x184   : > { %v705_v55 = vadd.f32 %v2701_v30, %v704_v54 }
 0x185   : > { %v1924_v56 = vpop.f32.mrf.mxu0 }
 0x186   : > { %v804_v58 = vmax.f32 %v705_v55, 0.0 }
 0x187   : > { %v709_v59 = vpop.f32.mrf.mxu0 }
 0x188   : > { %v836_v60 = vpack.c.bf16 %v804_v58, %v803_v57  ;;  %v710_v62 = vadd.f32 %v2701_v30, %v709_v59 }
 0x189   : > { %v1927_v61 = vpop.f32.mrf.mxu0 }
 0x18a   : > { %2026 = vmatmul.mubr.msk.bf16.gmra.mxu1 %vm463_vm1, %v836_v60  ;;  %v805_v3 = vmax.f32 %v710_v62, 0.0 }
 0x18b   : > { %v712_v63 = vpop.f32.mrf.mxu0  ;;  %2029 = vmatprep.mubr.msk.bf16.mxu1 %vm2438_vm0, %v2437_v0 }
 0x18c   : > { %v713_v1 = vadd.f32 %v2701_v30, %v712_v63 }
 0x18d   : > { %v1928_v2 = vpop.f32.mrf.mxu0 }
 0x18e   : > { %v806_v4 = vmax.f32 %v713_v1, 0.0 }
 0x18f   : > { %v717_v5 = vpop.f32.mrf.mxu0 }
 0x190   : > { %v837_v6 = vpack.c.bf16 %v806_v4, %v805_v3  ;;  %v718_v8 = vadd.f32 %v2701_v30, %v717_v5  ;;  %v849_v5 = vld [vmem:[%s2569_s26] sm:$0xff] }
 0x191   : > { %v1931_v7 = vpop.f32.mrf.mxu0 }
 0x192   : > { %2030 = vmatmul.mubr.msk.bf16.gmra.mxu1 %vm463_vm1, %v837_v6  ;;  %v807_v12 = vmax.f32 %v718_v8, 0.0 }
 0x193   : > { %v720_v9 = vpop.f32.mrf.mxu0  ;;  %2033 = vmatprep.mubr.msk.bf16.mxu1 %vm2438_vm0, %v2437_v0 }
 0x194   : > { %v721_v10 = vadd.f32 %v2701_v30, %v720_v9  ;;  %v850_v9 = vld [vmem:[%s2569_s26 + $0x8] sm:$0xff] }
 0x195   : > { %v1932_v11 = vpop.f32.mrf.mxu0 }
 0x196   : > { %v808_v13 = vmax.f32 %v721_v10, 0.0 }
 0x197   : > { %v725_v14 = vpop.f32.mrf.mxu0 }
 0x198   : > { %v838_v15 = vpack.c.bf16 %v808_v13, %v807_v12  ;;  %v726_v17 = vadd.f32 %v2701_v30, %v725_v14  ;;  %v851_v13 = vld [vmem:[%s2569_s26 + $0x10] sm:$0xff] }
 0x199   : > { %v1935_v16 = vpop.f32.mrf.mxu0 }
 0x19a   : > { %2034 = vmatmul.mubr.msk.bf16.gmra.mxu1 %vm463_vm1, %v838_v15  ;;  %v809_v21 = vmax.f32 %v726_v17, 0.0  ;;  %v852_v17 = vld [vmem:[%s2569_s26 + $0x18] sm:$0xff] }
 0x19b   : > { %v728_v18 = vpop.f32.mrf.mxu0  ;;  %2037 = vmatprep.mubr.msk.bf16.mxu1 %vm2438_vm0, %v2437_v0 }
 0x19c   : > { %v729_v19 = vadd.f32 %v2701_v30, %v728_v18 }
 0x19d   : > { %v1936_v20 = vpop.f32.mrf.mxu0 }
 0x19e   : > { %v810_v22 = vmax.f32 %v729_v19, 0.0 }
 0x19f   : > { %v733_v23 = vpop.f32.mrf.mxu0 }
 0x1a0   : > { %v839_v24 = vpack.c.bf16 %v810_v22, %v809_v21  ;;  %v734_v26 = vadd.f32 %v2701_v30, %v733_v23  ;;  %v853_v22 = vld [vmem:[%s2569_s26 + $0x20] sm:$0xff] }
 0x1a1   : > { %v1939_v25 = vpop.f32.mrf.mxu0 }
 0x1a2   : > { %2038 = vmatmul.mubr.msk.bf16.gmra.mxu1 %vm463_vm1, %v839_v24  ;;  %v811_v31 = vmax.f32 %v734_v26, 0.0 }
 0x1a3   : > { %v736_v27 = vpop.f32.mrf.mxu0  ;;  %2041 = vmatprep.mubr.msk.bf16.mxu1 %vm2438_vm0, %v2437_v0 }
 0x1a4   : > { %v737_v28 = vadd.f32 %v2701_v30, %v736_v27 }
 0x1a5   : > { %v1940_v29 = vpop.f32.mrf.mxu0 }
 0x1a6   : > { %v812_v32 = vmax.f32 %v737_v28, 0.0  ;;  %v854_v28 = vld [vmem:[%s2569_s26 + $0x28] sm:$0xff] }
 0x1a7   : > { %v741_v33 = vpop.f32.mrf.mxu0 }
 0x1a8   : > { %v840_v34 = vpack.c.bf16 %v812_v32, %v811_v31  ;;  %v742_v36 = vadd.f32 %v2701_v30, %v741_v33 }
 0x1a9   : > { %v1943_v35 = vpop.f32.mrf.mxu0 }
 0x1aa   : > { %2042 = vmatmul.mubr.msk.bf16.gmra.mxu1 %vm463_vm1, %v840_v34  ;;  %v813_v40 = vmax.f32 %v742_v36, 0.0  ;;  %v855_v36 = vld [vmem:[%s2569_s26 + $0x30] sm:$0xff] }
 0x1ab   : > { %v744_v37 = vpop.f32.mrf.mxu0  ;;  %2045 = vmatprep.mubr.msk.bf16.mxu1 %vm2438_vm0, %v2437_v0 }
 0x1ac   : > { %v745_v38 = vadd.f32 %v2701_v30, %v744_v37 }
 0x1ad   : > { %v1944_v39 = vpop.f32.mrf.mxu0 }
 0x1ae   : > { %v814_v41 = vmax.f32 %v745_v38, 0.0 }
 0x1af   : > { %v749_v42 = vpop.f32.mrf.mxu0 }
 0x1b0   : > { %v841_v43 = vpack.c.bf16 %v814_v41, %v813_v40  ;;  %v750_v45 = vadd.f32 %v2701_v30, %v749_v42 }
 0x1b1   : > { %v1947_v44 = vpop.f32.mrf.mxu0 }
 0x1b2   : > { %2046 = vmatmul.mubr.msk.bf16.gmra.mxu1 %vm463_vm1, %v841_v43  ;;  %v815_v49 = vmax.f32 %v750_v45, 0.0  ;;  %v856_v43 = vld [vmem:[%s2569_s26 + $0x38] sm:$0xff] }
 0x1b3   : > { %v752_v46 = vpop.f32.mrf.mxu0  ;;  %2049 = vmatprep.mubr.msk.bf16.mxu1 %vm2438_vm0, %v2437_v0 }
 0x1b4   : > { %v753_v47 = vadd.f32 %v2701_v30, %v752_v46 }
 0x1b5   : > { %v1948_v48 = vpop.f32.mrf.mxu0 }
 0x1b6   : > { %v816_v50 = vmax.f32 %v753_v47, 0.0 }
 0x1b7   : > { %v757_v51 = vpop.f32.mrf.mxu0 }
 0x1b8   : > { %v842_v52 = vpack.c.bf16 %v816_v50, %v815_v49  ;;  %v758_v54 = vadd.f32 %v2701_v30, %v757_v51  ;;  %v857_v50 = vld [vmem:[%s2569_s26 + $0x40] sm:$0xff] }
 0x1b9   : > { %v1951_v53 = vpop.f32.mrf.mxu0 }
 0x1ba   : > { %2050 = vmatmul.mubr.msk.bf16.gmra.mxu1 %vm463_vm1, %v842_v52  ;;  %v817_v58 = vmax.f32 %v758_v54, 0.0 }
 0x1bb   : > { %v760_v55 = vpop.f32.mrf.mxu0  ;;  %2053 = vmatprep.mubr.msk.bf16.mxu1 %vm2438_vm0, %v2437_v0 }
 0x1bc   : > { %v761_v56 = vadd.f32 %v2701_v30, %v760_v55 }
 0x1bd   : > { %v1952_v57 = vpop.f32.mrf.mxu0 }
 0x1be   : > { %v818_v59 = vmax.f32 %v761_v56, 0.0  ;;  %v858_v57 = vld [vmem:[%s2569_s26 + $0x48] sm:$0xff] }
 0x1bf   : > { %v765_v60 = vpop.f32.mrf.mxu0 }
 0x1c0   : > { %v843_v61 = vpack.c.bf16 %v818_v59, %v817_v58  ;;  %v766_v62 = vadd.f32 %v2701_v30, %v765_v60 }
 0x1c1   : > { %v1955_v63 = vpop.f32.mrf.mxu0 }
 0x1c2   : > { %v819_v1 = vmax.f32 %v766_v62, 0.0  ;;  %2054 = vmatmul.mubr.msk.bf16.gmra.mxu1 %vm463_vm1, %v843_v61 }
 0x1c3   : > { %v768_v2 = vpop.f32.mrf.mxu0  ;;  %2057 = vmatprep.mubr.msk.bf16.mxu1 %vm2438_vm0, %v2437_v0 }
 0x1c4   : > { %v844_v4 = vpack.c.bf16 %v819_v1, %v819_v1  ;;  %v859_v2 = vld [vmem:[%s2569_s26 + $0x50] sm:$0xff] }
 0x1c5   : > { %v1956_v3 = vpop.f32.mrf.mxu0 }
 0x1ca   : > { %v1019_v6 = vpop.f32.mrf.mxu1  ;;  %2058 = vmatmul.mubr.msk.bf16.gmra.mxu1 %vm463_vm1, %v844_v4 }
 0x1cb   : > { %v1020_v7 = vadd.f32 %v1019_v6, %v849_v5 }
 0x1cc   : > { %v1963_v8 = vpop.f32.mrf.mxu1 }
 0x1cd   : > { %v1745_v30 = vmul.f32 -1.442695, %v1020_v7 }
 0x1ce   : > { %v1022_v10 = vpop.f32.mrf.mxu1 }
 0x1cf   : > { %2144 = vpow2.f32 %v1745_v30  ;;  %v1023_v11 = vadd.f32 %v1022_v10, %v850_v9  ;;  %v860_v30 = vld [vmem:[%s2569_s26 + $0x58] sm:$0xff] }
 0x1d0   : > { %v1964_v12 = vpop.f32.mrf.mxu1 }
 0x1d1   : > { %v1746_v14 = vmul.f32 -1.442695, %v1023_v11 }
 0x1d2   : > { %v1027_v15 = vpop.f32.mrf.mxu1 }
 0x1d3   : > { %2146 = vpow2.f32 %v1746_v14  ;;  %v1028_v0 = vadd.f32 %v1027_v15, %v851_v13 }
 0x1d4   : > { %v1967_v16 = vpop.f32.mrf.mxu1 }
 0x1d5   : > { %v1747_v18 = vmul.f32 -1.442695, %v1028_v0  ;;  %v861_v16 = vld [vmem:[%s2569_s26 + $0x60] sm:$0xff] }
 0x1d6   : > { %v1030_v19 = vpop.f32.mrf.mxu1 }
 0x1d7   : > { %2148 = vpow2.f32 %v1747_v18  ;;  %v1031_v20 = vadd.f32 %v1030_v19, %v852_v17 }
 0x1d8   : > { %v1968_v21 = vpop.f32.mrf.mxu1 }
 0x1d9   : > { %v1748_v23 = vmul.f32 -1.442695, %v1031_v20 }
 0x1da   : > { %v1035_v24 = vpop.f32.mrf.mxu1 }
 0x1db   : > { %2150 = vpow2.f32 %v1748_v23  ;;  %v1036_v25 = vadd.f32 %v1035_v24, %v853_v22  ;;  %v862_v24 = vld [vmem:[%s2569_s26 + $0x68] sm:$0xff] }
 0x1dc   : > { %v2145_v26 = vpop.eup %2144  ;;  %v1971_v27 = vpop.f32.mrf.mxu1 }
 0x1dd   : > { %v1364_v29 = vadd.f32 1.0, %v2145_v26  ;;  %v1749_v31 = vmul.f32 -1.442695, %v1036_v25 }
 0x1de   : > { %v1038_v32 = vpop.f32.mrf.mxu1 }
 0x1df   : > { %2152 = vrcp.f32 %v1364_v29  ;;  %v1039_v33 = vadd.f32 %v1038_v32, %v854_v28 }
 0x1e0   : > { %v2147_v34 = vpop.eup %2146  ;;  %2154 = vpow2.f32 %v1749_v31  ;;  %v1972_v35 = vpop.f32.mrf.mxu1 }
 0x1e1   : > { %v1365_v37 = vadd.f32 1.0, %v2147_v34  ;;  %v1750_v38 = vmul.f32 -1.442695, %v1039_v33  ;;  %v863_v33 = vld [vmem:[%s2569_s26 + $0x70] sm:$0xff] }
 0x1e2   : > { %v1043_v39 = vpop.f32.mrf.mxu1 }
 0x1e3   : > { %2156 = vrcp.f32 %v1365_v37  ;;  %v1044_v40 = vadd.f32 %v1043_v39, %v855_v36 }
 0x1e4   : > { %v2149_v41 = vpop.eup %2148  ;;  %2158 = vpow2.f32 %v1750_v38  ;;  %v1975_v42 = vpop.f32.mrf.mxu1 }
 0x1e5   : > { %v1366_v44 = vadd.f32 1.0, %v2149_v41  ;;  %v1751_v45 = vmul.f32 -1.442695, %v1044_v40  ;;  %v864_v41 = vld [vmem:[%s2569_s26 + $0x78] sm:$0xff] }
 0x1e6   : > { %v1046_v46 = vpop.f32.mrf.mxu1 }
 0x1e7   : > { %2160 = vrcp.f32 %v1366_v44  ;;  %v1047_v47 = vadd.f32 %v1046_v46, %v856_v43 }
 0x1e8   : > { %v2151_v48 = vpop.eup %2150  ;;  %2162 = vpow2.f32 %v1751_v45  ;;  %v1976_v49 = vpop.f32.mrf.mxu1 }
 0x1e9   : > { %v1367_v51 = vadd.f32 1.0, %v2151_v48  ;;  %v1752_v52 = vmul.f32 -1.442695, %v1047_v47  ;;  %v865_v49 = vld [vmem:[%s2569_s26 + $0x80] sm:$0xff] }
 0x1ea   : > { %v1051_v53 = vpop.f32.mrf.mxu1 }
 0x1eb   : > { %2164 = vrcp.f32 %v1367_v51  ;;  %v1052_v54 = vadd.f32 %v1051_v53, %v857_v50 }
 0x1ec   : > { %v2153_v55 = vpop.eup %2152  ;;  %2166 = vpow2.f32 %v1752_v52  ;;  %v1979_v56 = vpop.f32.mrf.mxu1 }
 0x1ed   : > { %v2155_v58 = vpop.eup %2154  ;;  %1511 = vst [vmem:[%s2838_s14] sm:$0xff] %v2153_v55  ;;  %v1753_v59 = vmul.f32 -1.442695, %v1052_v54 }
 0x1ee   : > { %v1368_v60 = vadd.f32 1.0, %v2155_v58  ;;  %v1054_v61 = vpop.f32.mrf.mxu1 }
 0x1ef   : > { %2168 = vpow2.f32 %v1753_v59  ;;  %v1055_v62 = vadd.f32 %v1054_v61, %v858_v57  ;;  %v866_v57 = vld [vmem:[%s2569_s26 + $0x88] sm:$0xff] }
 0x1f0   : > { %v2157_v63 = vpop.eup %2156  ;;  %2170 = vrcp.f32 %v1368_v60  ;;  %v1980_v1 = vpop.f32.mrf.mxu1 }
 0x1f1   : > { %v2159_v3 = vpop.eup %2158  ;;  %1512 = vst [vmem:[%s2838_s14 + $0x8] sm:$0xff] %v2157_v63  ;;  %v1754_v4 = vmul.f32 -1.442695, %v1055_v62 }
 0x1f2   : > { %v1369_v5 = vadd.f32 1.0, %v2159_v3  ;;  %v1059_v6 = vpop.f32.mrf.mxu1 }
 0x1f3   : > { %2172 = vpow2.f32 %v1754_v4  ;;  %v1060_v7 = vadd.f32 %v1059_v6, %v859_v2  ;;  %v867_v2 = vld [vmem:[%s2569_s26 + $0x90] sm:$0xff] }
 0x1f4   : > { %v2161_v8 = vpop.eup %2160  ;;  %2174 = vrcp.f32 %v1369_v5  ;;  %v1983_v9 = vpop.f32.mrf.mxu1 }
 0x1f5   : > { %v2163_v10 = vpop.eup %2162  ;;  %1513 = vst [vmem:[%s2838_s14 + $0x10] sm:$0xff] %v2161_v8  ;;  %v1755_v11 = vmul.f32 -1.442695, %v1060_v7 }
 0x1f6   : > { %v1370_v12 = vadd.f32 1.0, %v2163_v10  ;;  %v1062_v13 = vpop.f32.mrf.mxu1 }
 0x1f7   : > { %2176 = vpow2.f32 %v1755_v11  ;;  %v1063_v14 = vadd.f32 %v1062_v13, %v860_v30  ;;  %v868_v30 = vld [vmem:[%s2569_s26 + $0x98] sm:$0xff] }
 0x1f8   : > { %v2165_v15 = vpop.eup %2164  ;;  %2178 = vrcp.f32 %v1370_v12  ;;  %v1984_v0 = vpop.f32.mrf.mxu1 }
 0x1f9   : > { %v2167_v17 = vpop.eup %2166  ;;  %1514 = vst [vmem:[%s2838_s14 + $0x18] sm:$0xff] %v2165_v15  ;;  %v1756_v18 = vmul.f32 -1.442695, %v1063_v14 }
 0x1fa   : > { %v1371_v19 = vadd.f32 1.0, %v2167_v17  ;;  %v1067_v20 = vpop.f32.mrf.mxu1 }
 0x1fb   : > { %2180 = vpow2.f32 %v1756_v18  ;;  %v1068_v21 = vadd.f32 %v1067_v20, %v861_v16  ;;  %v869_v16 = vld [vmem:[%s2569_s26 + $0xa0] sm:$0xff] }
 0x1fc   : > { %v2169_v22 = vpop.eup %2168  ;;  %2182 = vrcp.f32 %v1371_v19  ;;  %v1987_v23 = vpop.f32.mrf.mxu1 }
 0x1fd   : > { %v2171_v25 = vpop.eup %2170  ;;  %v1372_v26 = vadd.f32 1.0, %v2169_v22  ;;  %v1757_v27 = vmul.f32 -1.442695, %v1068_v21 }
 0x1fe   : > { %1515 = vst [vmem:[%s2838_s14 + $0x20] sm:$0xff] %v2171_v25  ;;  %v1070_v28 = vpop.f32.mrf.mxu1 }
 0x1ff   : > { %2184 = vrcp.f32 %v1372_v26  ;;  %v1071_v29 = vadd.f32 %v1070_v28, %v862_v24  ;;  %v870_v24 = vld [vmem:[%s2569_s26 + $0xa8] sm:$0xff] }
 0x200   : > { %v2173_v31 = vpop.eup %2172  ;;  %2186 = vpow2.f32 %v1757_v27  ;;  %v1988_v32 = vpop.f32.mrf.mxu1 }
 0x201   : > { %v2175_v34 = vpop.eup %2174  ;;  %v1373_v35 = vadd.f32 1.0, %v2173_v31  ;;  %v1758_v36 = vmul.f32 -1.442695, %v1071_v29 }
 0x202   : > { %1516 = vst [vmem:[%s2838_s14 + $0x28] sm:$0xff] %v2175_v34  ;;  %v1075_v37 = vpop.f32.mrf.mxu1 }
 0x203   : > { %2188 = vrcp.f32 %v1373_v35  ;;  %v1076_v38 = vadd.f32 %v1075_v37, %v863_v33  ;;  %v871_v33 = vld [vmem:[%s2569_s26 + $0xb0] sm:$0xff] }
 0x204   : > { %v2177_v39 = vpop.eup %2176  ;;  %2190 = vpow2.f32 %v1758_v36  ;;  %v1991_v40 = vpop.f32.mrf.mxu1 }
 0x205   : > { %v2179_v42 = vpop.eup %2178  ;;  %v1374_v43 = vadd.f32 1.0, %v2177_v39  ;;  %v1759_v44 = vmul.f32 -1.442695, %v1076_v38 }
 0x206   : > { %1517 = vst [vmem:[%s2838_s14 + $0x30] sm:$0xff] %v2179_v42  ;;  %v1078_v45 = vpop.f32.mrf.mxu1 }
 0x207   : > { %2192 = vrcp.f32 %v1374_v43  ;;  %v1079_v46 = vadd.f32 %v1078_v45, %v864_v41  ;;  %v872_v41 = vld [vmem:[%s2569_s26 + $0xb8] sm:$0xff] }
 0x208   : > { %v2181_v47 = vpop.eup %2180  ;;  %2194 = vpow2.f32 %v1759_v44  ;;  %v1992_v48 = vpop.f32.mrf.mxu1 }
 0x209   : > { %v2183_v50 = vpop.eup %2182  ;;  %v1375_v51 = vadd.f32 1.0, %v2181_v47  ;;  %v1760_v52 = vmul.f32 -1.442695, %v1079_v46 }
 0x20a   : > { %1518 = vst [vmem:[%s2838_s14 + $0x38] sm:$0xff] %v2183_v50  ;;  %v1083_v53 = vpop.f32.mrf.mxu1 }
 0x20b   : > { %2196 = vrcp.f32 %v1375_v51  ;;  %v1084_v54 = vadd.f32 %v1083_v53, %v865_v49  ;;  %v873_v49 = vld [vmem:[%s2569_s26 + $0xc0] sm:$0xff] }
 0x20c   : > { %v2185_v55 = vpop.eup %2184  ;;  %2198 = vpow2.f32 %v1760_v52  ;;  %v1995_v56 = vpop.f32.mrf.mxu1 }
 0x20d   : > { %v2187_v58 = vpop.eup %2186  ;;  %1519 = vst [vmem:[%s2838_s14 + $0x40] sm:$0xff] %v2185_v55  ;;  %v1761_v59 = vmul.f32 -1.442695, %v1084_v54 }
 0x20e   : > { %v1376_v60 = vadd.f32 1.0, %v2187_v58  ;;  %v1086_v61 = vpop.f32.mrf.mxu1 }
 0x20f   : > { %2200 = vpow2.f32 %v1761_v59  ;;  %v1087_v62 = vadd.f32 %v1086_v61, %v866_v57  ;;  %v874_v57 = vld [vmem:[%s2569_s26 + $0xc8] sm:$0xff] }
 0x210   : > { %v2189_v63 = vpop.eup %2188  ;;  %2202 = vrcp.f32 %v1376_v60  ;;  %v1996_v1 = vpop.f32.mrf.mxu1 }
 0x211   : > { %v2191_v3 = vpop.eup %2190  ;;  %1520 = vst [vmem:[%s2838_s14 + $0x48] sm:$0xff] %v2189_v63  ;;  %v1762_v4 = vmul.f32 -1.442695, %v1087_v62 }
 0x212   : > { %v1377_v5 = vadd.f32 1.0, %v2191_v3  ;;  %v1091_v6 = vpop.f32.mrf.mxu1 }
 0x213   : > { %2204 = vpow2.f32 %v1762_v4  ;;  %v1092_v7 = vadd.f32 %v1091_v6, %v867_v2  ;;  %v875_v2 = vld [vmem:[%s2569_s26 + $0xd0] sm:$0xff] }
 0x214   : > { %v2193_v8 = vpop.eup %2192  ;;  %2206 = vrcp.f32 %v1377_v5  ;;  %v1999_v9 = vpop.f32.mrf.mxu1 }
 0x215   : > { %v2195_v10 = vpop.eup %2194  ;;  %1521 = vst [vmem:[%s2838_s14 + $0x50] sm:$0xff] %v2193_v8  ;;  %v1763_v11 = vmul.f32 -1.442695, %v1092_v7 }
 0x216   : > { %v1378_v12 = vadd.f32 1.0, %v2195_v10  ;;  %v1094_v13 = vpop.f32.mrf.mxu1 }
 0x217   : > { %2208 = vpow2.f32 %v1763_v11  ;;  %v1095_v14 = vadd.f32 %v1094_v13, %v868_v30  ;;  %v876_v30 = vld [vmem:[%s2569_s26 + $0xd8] sm:$0xff] }
 0x218   : > { %v2197_v15 = vpop.eup %2196  ;;  %2210 = vrcp.f32 %v1378_v12  ;;  %v2000_v0 = vpop.f32.mrf.mxu1 }
 0x219   : > { %v2199_v17 = vpop.eup %2198  ;;  %1522 = vst [vmem:[%s2838_s14 + $0x58] sm:$0xff] %v2197_v15  ;;  %v1764_v18 = vmul.f32 -1.442695, %v1095_v14 }
 0x21a   : > { %v1379_v19 = vadd.f32 1.0, %v2199_v17  ;;  %v1099_v20 = vpop.f32.mrf.mxu1 }
 0x21b   : > { %2212 = vpow2.f32 %v1764_v18  ;;  %v1100_v21 = vadd.f32 %v1099_v20, %v869_v16  ;;  %v877_v16 = vld [vmem:[%s2569_s26 + $0xe0] sm:$0xff] }
 0x21c   : > { %v2201_v22 = vpop.eup %2200  ;;  %2214 = vrcp.f32 %v1379_v19  ;;  %v2003_v23 = vpop.f32.mrf.mxu1 }
 0x21d   : > { %v2203_v25 = vpop.eup %2202  ;;  %v1380_v26 = vadd.f32 1.0, %v2201_v22  ;;  %v1765_v27 = vmul.f32 -1.442695, %v1100_v21 }
 0x21e   : > { %1523 = vst [vmem:[%s2838_s14 + $0x60] sm:$0xff] %v2203_v25  ;;  %v1102_v28 = vpop.f32.mrf.mxu1 }
 0x21f   : > { %2216 = vrcp.f32 %v1380_v26  ;;  %v1103_v29 = vadd.f32 %v1102_v28, %v870_v24  ;;  %v878_v24 = vld [vmem:[%s2569_s26 + $0xe8] sm:$0xff] }
 0x220   : > { %v2205_v31 = vpop.eup %2204  ;;  %2218 = vpow2.f32 %v1765_v27  ;;  %v2004_v32 = vpop.f32.mrf.mxu1 }
 0x221   : > { %v2207_v34 = vpop.eup %2206  ;;  %v1381_v35 = vadd.f32 1.0, %v2205_v31  ;;  %v1766_v36 = vmul.f32 -1.442695, %v1103_v29 }
 0x222   : > { %1524 = vst [vmem:[%s2838_s14 + $0x68] sm:$0xff] %v2207_v34  ;;  %v1107_v37 = vpop.f32.mrf.mxu1 }
 0x223   : > { %2220 = vrcp.f32 %v1381_v35  ;;  %v1108_v38 = vadd.f32 %v1107_v37, %v871_v33  ;;  %v879_v33 = vld [vmem:[%s2569_s26 + $0xf0] sm:$0xff] }
 0x224   : > { %v2209_v39 = vpop.eup %2208  ;;  %2222 = vpow2.f32 %v1766_v36  ;;  %v2007_v40 = vpop.f32.mrf.mxu1 }
 0x225   : > { %v2211_v42 = vpop.eup %2210  ;;  %v1382_v43 = vadd.f32 1.0, %v2209_v39  ;;  %v1767_v44 = vmul.f32 -1.442695, %v1108_v38 }
 0x226   : > { %1525 = vst [vmem:[%s2838_s14 + $0x70] sm:$0xff] %v2211_v42  ;;  %v1110_v45 = vpop.f32.mrf.mxu1 }
 0x227   : > { %2224 = vrcp.f32 %v1382_v43  ;;  %v1111_v46 = vadd.f32 %v1110_v45, %v872_v41  ;;  %v880_v41 = vld [vmem:[%s2569_s26 + $0xf8] sm:$0xff] }
 0x228   : > { %v2213_v47 = vpop.eup %2212  ;;  %2226 = vpow2.f32 %v1767_v44  ;;  %v2008_v48 = vpop.f32.mrf.mxu1 }
 0x229   : > { %v2215_v50 = vpop.eup %2214  ;;  %v1383_v51 = vadd.f32 1.0, %v2213_v47  ;;  %v1768_v52 = vmul.f32 -1.442695, %v1111_v46 }
 0x22a   : > { %1526 = vst [vmem:[%s2838_s14 + $0x78] sm:$0xff] %v2215_v50  ;;  %v1115_v53 = vpop.f32.mrf.mxu1 }
 0x22b   : > { %2228 = vrcp.f32 %v1383_v51  ;;  %v1116_v54 = vadd.f32 %v1115_v53, %v873_v49  ;;  %v881_v49 = vld [vmem:[%s2569_s26 + $0x100] sm:$0xff] }
 0x22c   : > { %v2217_v55 = vpop.eup %2216  ;;  %2230 = vpow2.f32 %v1768_v52  ;;  %v2011_v56 = vpop.f32.mrf.mxu1 }
 0x22d   : > { %v2219_v58 = vpop.eup %2218  ;;  %1527 = vst [vmem:[%s2838_s14 + $0x80] sm:$0xff] %v2217_v55  ;;  %v1769_v59 = vmul.f32 -1.442695, %v1116_v54 }
 0x22e   : > { %v1384_v60 = vadd.f32 1.0, %v2219_v58  ;;  %v1118_v61 = vpop.f32.mrf.mxu1 }
 0x22f   : > { %2232 = vpow2.f32 %v1769_v59  ;;  %v1119_v62 = vadd.f32 %v1118_v61, %v874_v57  ;;  %v882_v57 = vld [vmem:[%s2569_s26 + $0x108] sm:$0xff] }
 0x230   : > { %v2221_v63 = vpop.eup %2220  ;;  %2234 = vrcp.f32 %v1384_v60  ;;  %v2012_v1 = vpop.f32.mrf.mxu1 }
 0x231   : > { %v2223_v3 = vpop.eup %2222  ;;  %1528 = vst [vmem:[%s2838_s14 + $0x88] sm:$0xff] %v2221_v63  ;;  %v1770_v4 = vmul.f32 -1.442695, %v1119_v62 }
 0x232   : > { %v1385_v5 = vadd.f32 1.0, %v2223_v3  ;;  %v1123_v6 = vpop.f32.mrf.mxu1 }
 0x233   : > { %2236 = vpow2.f32 %v1770_v4  ;;  %v1124_v7 = vadd.f32 %v1123_v6, %v875_v2  ;;  %v883_v2 = vld [vmem:[%s2569_s26 + $0x110] sm:$0xff] }
 0x234   : > { %v2225_v8 = vpop.eup %2224  ;;  %2238 = vrcp.f32 %v1385_v5  ;;  %v2015_v9 = vpop.f32.mrf.mxu1 }
 0x235   : > { %v2227_v10 = vpop.eup %2226  ;;  %1529 = vst [vmem:[%s2838_s14 + $0x90] sm:$0xff] %v2225_v8  ;;  %v1771_v11 = vmul.f32 -1.442695, %v1124_v7 }
 0x236   : > { %v1386_v12 = vadd.f32 1.0, %v2227_v10  ;;  %v1126_v13 = vpop.f32.mrf.mxu1 }
 0x237   : > { %2240 = vpow2.f32 %v1771_v11  ;;  %v1127_v14 = vadd.f32 %v1126_v13, %v876_v30  ;;  %v884_v30 = vld [vmem:[%s2569_s26 + $0x118] sm:$0xff] }
 0x238   : > { %v2229_v15 = vpop.eup %2228  ;;  %2242 = vrcp.f32 %v1386_v12  ;;  %v2016_v0 = vpop.f32.mrf.mxu1 }
 0x239   : > { %v2231_v17 = vpop.eup %2230  ;;  %1530 = vst [vmem:[%s2838_s14 + $0x98] sm:$0xff] %v2229_v15  ;;  %v1772_v18 = vmul.f32 -1.442695, %v1127_v14 }
 0x23a   : > { %v1387_v19 = vadd.f32 1.0, %v2231_v17  ;;  %v1131_v20 = vpop.f32.mrf.mxu1 }
 0x23b   : > { %2244 = vpow2.f32 %v1772_v18  ;;  %v1132_v21 = vadd.f32 %v1131_v20, %v877_v16  ;;  %v885_v16 = vld [vmem:[%s2569_s26 + $0x120] sm:$0xff] }
 0x23c   : > { %v2233_v22 = vpop.eup %2232  ;;  %2246 = vrcp.f32 %v1387_v19  ;;  %v2019_v23 = vpop.f32.mrf.mxu1 }
 0x23d   : > { %v2235_v25 = vpop.eup %2234  ;;  %v1388_v26 = vadd.f32 1.0, %v2233_v22  ;;  %v1773_v27 = vmul.f32 -1.442695, %v1132_v21 }
 0x23e   : > { %1531 = vst [vmem:[%s2838_s14 + $0xa0] sm:$0xff] %v2235_v25  ;;  %v1134_v28 = vpop.f32.mrf.mxu1 }
 0x23f   : > { %2248 = vrcp.f32 %v1388_v26  ;;  %v1135_v29 = vadd.f32 %v1134_v28, %v878_v24  ;;  %v886_v24 = vld [vmem:[%s2569_s26 + $0x128] sm:$0xff] }
 0x240   : > { %v2237_v31 = vpop.eup %2236  ;;  %2250 = vpow2.f32 %v1773_v27  ;;  %v2020_v32 = vpop.f32.mrf.mxu1 }
 0x241   : > { %v2239_v34 = vpop.eup %2238  ;;  %v1389_v35 = vadd.f32 1.0, %v2237_v31  ;;  %v1774_v36 = vmul.f32 -1.442695, %v1135_v29 }
 0x242   : > { %1532 = vst [vmem:[%s2838_s14 + $0xa8] sm:$0xff] %v2239_v34  ;;  %v1139_v37 = vpop.f32.mrf.mxu1 }
 0x243   : > { %2252 = vrcp.f32 %v1389_v35  ;;  %v1140_v38 = vadd.f32 %v1139_v37, %v879_v33  ;;  %v887_v33 = vld [vmem:[%s2569_s26 + $0x130] sm:$0xff] }
 0x244   : > { %v2241_v39 = vpop.eup %2240  ;;  %2254 = vpow2.f32 %v1774_v36  ;;  %v2023_v40 = vpop.f32.mrf.mxu1 }
 0x245   : > { %v2243_v42 = vpop.eup %2242  ;;  %v1390_v43 = vadd.f32 1.0, %v2241_v39  ;;  %v1775_v44 = vmul.f32 -1.442695, %v1140_v38 }
 0x246   : > { %1533 = vst [vmem:[%s2838_s14 + $0xb0] sm:$0xff] %v2243_v42  ;;  %v1142_v45 = vpop.f32.mrf.mxu1 }
 0x247   : > { %2256 = vrcp.f32 %v1390_v43  ;;  %v1143_v46 = vadd.f32 %v1142_v45, %v880_v41  ;;  %v888_v41 = vld [vmem:[%s2569_s26 + $0x138] sm:$0xff] }
 0x248   : > { %v2245_v47 = vpop.eup %2244  ;;  %2258 = vpow2.f32 %v1775_v44  ;;  %v2024_v48 = vpop.f32.mrf.mxu1 }
 0x249   : > { %v2247_v50 = vpop.eup %2246  ;;  %v1391_v51 = vadd.f32 1.0, %v2245_v47  ;;  %v1776_v52 = vmul.f32 -1.442695, %v1143_v46 }
 0x24a   : > { %1534 = vst [vmem:[%s2838_s14 + $0xb8] sm:$0xff] %v2247_v50  ;;  %v1147_v53 = vpop.f32.mrf.mxu1 }
 0x24b   : > { %2260 = vrcp.f32 %v1391_v51  ;;  %v1148_v54 = vadd.f32 %v1147_v53, %v881_v49  ;;  %v889_v49 = vld [vmem:[%s2569_s26 + $0x140] sm:$0xff] }
 0x24c   : > { %v2249_v55 = vpop.eup %2248  ;;  %2262 = vpow2.f32 %v1776_v52  ;;  %v2027_v56 = vpop.f32.mrf.mxu1 }
 0x24d   : > { %v2251_v58 = vpop.eup %2250  ;;  %1535 = vst [vmem:[%s2838_s14 + $0xc0] sm:$0xff] %v2249_v55  ;;  %v1777_v59 = vmul.f32 -1.442695, %v1148_v54 }
 0x24e   : > { %v1392_v60 = vadd.f32 1.0, %v2251_v58  ;;  %v1150_v61 = vpop.f32.mrf.mxu1 }
 0x24f   : > { %2264 = vpow2.f32 %v1777_v59  ;;  %v1151_v62 = vadd.f32 %v1150_v61, %v882_v57  ;;  %v890_v57 = vld [vmem:[%s2569_s26 + $0x148] sm:$0xff] }
 0x250   : > { %v2253_v63 = vpop.eup %2252  ;;  %2266 = vrcp.f32 %v1392_v60  ;;  %v2028_v1 = vpop.f32.mrf.mxu1 }
 0x251   : > { %v2255_v3 = vpop.eup %2254  ;;  %1536 = vst [vmem:[%s2838_s14 + $0xc8] sm:$0xff] %v2253_v63  ;;  %v1778_v4 = vmul.f32 -1.442695, %v1151_v62 }
 0x252   : > { %v1393_v5 = vadd.f32 1.0, %v2255_v3  ;;  %v1155_v6 = vpop.f32.mrf.mxu1 }
 0x253   : > { %2268 = vpow2.f32 %v1778_v4  ;;  %v1156_v7 = vadd.f32 %v1155_v6, %v883_v2  ;;  %v891_v2 = vld [vmem:[%s2569_s26 + $0x150] sm:$0xff] }
 0x254   : > { %v2257_v8 = vpop.eup %2256  ;;  %2270 = vrcp.f32 %v1393_v5  ;;  %v2031_v9 = vpop.f32.mrf.mxu1 }
 0x255   : > { %v2259_v10 = vpop.eup %2258  ;;  %1537 = vst [vmem:[%s2838_s14 + $0xd0] sm:$0xff] %v2257_v8  ;;  %v1779_v11 = vmul.f32 -1.442695, %v1156_v7 }
 0x256   : > { %v1394_v12 = vadd.f32 1.0, %v2259_v10  ;;  %v1158_v13 = vpop.f32.mrf.mxu1 }
 0x257   : > { %2272 = vpow2.f32 %v1779_v11  ;;  %v1159_v14 = vadd.f32 %v1158_v13, %v884_v30  ;;  %v892_v30 = vld [vmem:[%s2569_s26 + $0x158] sm:$0xff] }
 0x258   : > { %v2261_v15 = vpop.eup %2260  ;;  %2274 = vrcp.f32 %v1394_v12  ;;  %v2032_v0 = vpop.f32.mrf.mxu1 }
 0x259   : > { %v2263_v17 = vpop.eup %2262  ;;  %1538 = vst [vmem:[%s2838_s14 + $0xd8] sm:$0xff] %v2261_v15  ;;  %v1780_v18 = vmul.f32 -1.442695, %v1159_v14 }
 0x25a   : > { %v1395_v19 = vadd.f32 1.0, %v2263_v17  ;;  %v1163_v20 = vpop.f32.mrf.mxu1 }
 0x25b   : > { %2276 = vpow2.f32 %v1780_v18  ;;  %v1164_v21 = vadd.f32 %v1163_v20, %v885_v16  ;;  %v893_v16 = vld [vmem:[%s2569_s26 + $0x160] sm:$0xff] }
 0x25c   : > { %v2265_v22 = vpop.eup %2264  ;;  %2278 = vrcp.f32 %v1395_v19  ;;  %v2035_v23 = vpop.f32.mrf.mxu1 }
 0x25d   : > { %v2267_v25 = vpop.eup %2266  ;;  %v1396_v26 = vadd.f32 1.0, %v2265_v22  ;;  %v1781_v27 = vmul.f32 -1.442695, %v1164_v21 }
 0x25e   : > { %1539 = vst [vmem:[%s2838_s14 + $0xe0] sm:$0xff] %v2267_v25  ;;  %v1166_v28 = vpop.f32.mrf.mxu1 }
 0x25f   : > { %2280 = vrcp.f32 %v1396_v26  ;;  %v1167_v29 = vadd.f32 %v1166_v28, %v886_v24  ;;  %v894_v24 = vld [vmem:[%s2569_s26 + $0x168] sm:$0xff] }
 0x260   : > { %v2269_v31 = vpop.eup %2268  ;;  %2282 = vpow2.f32 %v1781_v27  ;;  %v2036_v32 = vpop.f32.mrf.mxu1 }
 0x261   : > { %v2271_v34 = vpop.eup %2270  ;;  %v1397_v35 = vadd.f32 1.0, %v2269_v31  ;;  %v1782_v36 = vmul.f32 -1.442695, %v1167_v29 }
 0x262   : > { %1540 = vst [vmem:[%s2838_s14 + $0xe8] sm:$0xff] %v2271_v34  ;;  %v1171_v37 = vpop.f32.mrf.mxu1 }
 0x263   : > { %2284 = vrcp.f32 %v1397_v35  ;;  %v1172_v38 = vadd.f32 %v1171_v37, %v887_v33  ;;  %v895_v33 = vld [vmem:[%s2569_s26 + $0x170] sm:$0xff] }
 0x264   : > { %v2273_v39 = vpop.eup %2272  ;;  %2286 = vpow2.f32 %v1782_v36  ;;  %v2039_v40 = vpop.f32.mrf.mxu1 }
 0x265   : > { %v2275_v42 = vpop.eup %2274  ;;  %v1398_v43 = vadd.f32 1.0, %v2273_v39  ;;  %v1783_v44 = vmul.f32 -1.442695, %v1172_v38 }
 0x266   : > { %1541 = vst [vmem:[%s2838_s14 + $0xf0] sm:$0xff] %v2275_v42  ;;  %v1174_v45 = vpop.f32.mrf.mxu1 }
 0x267   : > { %2288 = vrcp.f32 %v1398_v43  ;;  %v1175_v46 = vadd.f32 %v1174_v45, %v888_v41  ;;  %v896_v41 = vld [vmem:[%s2569_s26 + $0x178] sm:$0xff] }
 0x268   : > { %v2277_v47 = vpop.eup %2276  ;;  %2290 = vpow2.f32 %v1783_v44  ;;  %v2040_v48 = vpop.f32.mrf.mxu1 }
 0x269   : > { %v2279_v50 = vpop.eup %2278  ;;  %v1399_v51 = vadd.f32 1.0, %v2277_v47  ;;  %v1784_v52 = vmul.f32 -1.442695, %v1175_v46 }
 0x26a   : > { %1542 = vst [vmem:[%s2838_s14 + $0xf8] sm:$0xff] %v2279_v50  ;;  %v1179_v53 = vpop.f32.mrf.mxu1 }
 0x26b   : > { %2292 = vrcp.f32 %v1399_v51  ;;  %v1180_v54 = vadd.f32 %v1179_v53, %v889_v49  ;;  %v897_v49 = vld [vmem:[%s2569_s26 + $0x180] sm:$0xff]  ;;  %s1574_s26 = sshll.u32 %s2838_s14, 4  ;;  %s2934_s26 = int_to_ptr.vmem [resolvable:$true] %s1574_s26 }
 0x26c   : > { %v2281_v55 = vpop.eup %2280  ;;  %2294 = vpow2.f32 %v1784_v52  ;;  %v2043_v56 = vpop.f32.mrf.mxu1  ;;  %s2368_s8 = scalar_lea.vmem %s2934_s26, 6272  ;;  %p2375_p7 = scmp.lt.s32.totalorder %s2934_s26, %s2373_s9 }
 0x26d   : > { %v2283_v58 = vpop.eup %2282  ;;  %1543 = vst [vmem:[%s2838_s14 + $0x100] sm:$0xff] %v2281_v55  ;;  %v1785_v59 = vmul.f32 -1.442695, %v1180_v54  ;;  %p2369_p12 = scmp.ne.s32.totalorder %s2934_s26, %s2368_s8  ;;  %p2376_p8 = scmp.lt.s32.totalorder %s2374_s10, %s2368_s8 }
 0x26e   : > { %v1400_v60 = vadd.f32 1.0, %v2283_v58  ;;  %v1182_v61 = vpop.f32.mrf.mxu1 }
 0x26f   : > { %2296 = vpow2.f32 %v1785_v59  ;;  %v1183_v62 = vadd.f32 %v1182_v61, %v890_v57  ;;  %p2370_p4 = pnand %p2369_p12, %p2991_p13  ;;  %p2377_p10 = por %p2376_p8, %p2375_p7 }
 0x270   : > { %v2285_v63 = vpop.eup %2284  ;;  %2298 = vrcp.f32 %v1400_v60  ;;  %v2044_v1 = vpop.f32.mrf.mxu1 }
 0x271   : > { %v2287_v3 = vpop.eup %2286  ;;  %1544 = vst [vmem:[%s2838_s14 + $0x108] sm:$0xff] %v2285_v63  ;;  %v1786_v4 = vmul.f32 -1.442695, %v1183_v62  ;;  %p2371_p5 = pneg %p2370_p4 }
 0x272   : > { %v1401_v5 = vadd.f32 1.0, %v2287_v3  ;;  %v1187_v6 = vpop.f32.mrf.mxu1 }
 0x273   : > { %2300 = vpow2.f32 %v1786_v4  ;;  %v1188_v7 = vadd.f32 %v1187_v6, %v891_v2  ;;  %p2378_p0 = pnand %p2377_p10, %p2371_p5 }
 0x274   : > { %v2289_v8 = vpop.eup %2288  ;;  %2302 = vrcp.f32 %v1401_v5  ;;  %v2047_v9 = vpop.f32.mrf.mxu1 }
 0x275   : > { %v2291_v10 = vpop.eup %2290  ;;  %1545 = vst [vmem:[%s2838_s14 + $0x110] sm:$0xff] %v2289_v8  ;;  %v1787_v11 = vmul.f32 -1.442695, %v1188_v7 }
 0x276   : > { %v1402_v12 = vadd.f32 1.0, %v2291_v10  ;;  %v1190_v13 = vpop.f32.mrf.mxu1 }
 0x277   : > { %2304 = vpow2.f32 %v1787_v11  ;;  %v1191_v14 = vadd.f32 %v1190_v13, %v892_v30 }
 0x278   : > { %v2293_v15 = vpop.eup %2292  ;;  %2306 = vrcp.f32 %v1402_v12  ;;  %v2048_v0 = vpop.f32.mrf.mxu1 }
 0x279   : > { %v2295_v17 = vpop.eup %2294  ;;  %1546 = vst [vmem:[%s2838_s14 + $0x118] sm:$0xff] %v2293_v15  ;;  %v1788_v18 = vmul.f32 -1.442695, %v1191_v14 }
 0x27a   : > { %v1403_v19 = vadd.f32 1.0, %v2295_v17  ;;  %v1195_v20 = vpop.f32.mrf.mxu1 }
 0x27b   : > { %2308 = vpow2.f32 %v1788_v18  ;;  %v1196_v21 = vadd.f32 %v1195_v20, %v893_v16 }
 0x27c   : > { %v2297_v22 = vpop.eup %2296  ;;  %2310 = vrcp.f32 %v1403_v19  ;;  %v2051_v23 = vpop.f32.mrf.mxu1 }
 0x27d   : > { %v2299_v25 = vpop.eup %2298  ;;  %v1404_v26 = vadd.f32 1.0, %v2297_v22  ;;  %v1789_v27 = vmul.f32 -1.442695, %v1196_v21 }
 0x27e   : > { %1547 = vst [vmem:[%s2838_s14 + $0x120] sm:$0xff] %v2299_v25  ;;  %v1198_v28 = vpop.f32.mrf.mxu1 }
 0x27f   : > { %2312 = vrcp.f32 %v1404_v26  ;;  %v1199_v29 = vadd.f32 %v1198_v28, %v894_v24 }
 0x280   : > { %v2301_v31 = vpop.eup %2300  ;;  %2314 = vpow2.f32 %v1789_v27  ;;  %v2052_v32 = vpop.f32.mrf.mxu1 }
 0x281   : > { %v2303_v34 = vpop.eup %2302  ;;  %v1405_v35 = vadd.f32 1.0, %v2301_v31  ;;  %v1790_v36 = vmul.f32 -1.442695, %v1199_v29 }
 0x282   : > { %1548 = vst [vmem:[%s2838_s14 + $0x128] sm:$0xff] %v2303_v34  ;;  %v1203_v37 = vpop.f32.mrf.mxu1 }
 0x283   : > { %2316 = vrcp.f32 %v1405_v35  ;;  %v1204_v38 = vadd.f32 %v1203_v37, %v895_v33 }
 0x284   : > { %v2305_v39 = vpop.eup %2304  ;;  %2318 = vpow2.f32 %v1790_v36  ;;  %v2055_v40 = vpop.f32.mrf.mxu1 }
 0x285   : > { %v2307_v42 = vpop.eup %2306  ;;  %v1406_v43 = vadd.f32 1.0, %v2305_v39  ;;  %v1791_v44 = vmul.f32 -1.442695, %v1204_v38 }
 0x286   : > { %1549 = vst [vmem:[%s2838_s14 + $0x130] sm:$0xff] %v2307_v42  ;;  %v1206_v45 = vpop.f32.mrf.mxu1 }
 0x287   : > { %2320 = vrcp.f32 %v1406_v43  ;;  %v1207_v46 = vadd.f32 %v1206_v45, %v896_v41 }
 0x288   : > { %v2309_v47 = vpop.eup %2308  ;;  %2322 = vpow2.f32 %v1791_v44  ;;  %v2056_v48 = vpop.f32.mrf.mxu1 }
 0x289   : > { %v2311_v50 = vpop.eup %2310  ;;  %v1407_v51 = vadd.f32 1.0, %v2309_v47  ;;  %v1792_v52 = vmul.f32 -1.442695, %v1207_v46 }
 0x28a   : > { %1550 = vst [vmem:[%s2838_s14 + $0x138] sm:$0xff] %v2311_v50  ;;  %v1211_v53 = vpop.f32.mrf.mxu1 }
 0x28b   : > { %2324 = vrcp.f32 %v1407_v51  ;;  %v1212_v54 = vadd.f32 %v1211_v53, %v897_v49 }
 0x28c   : > { %v2313_v55 = vpop.eup %2312  ;;  %2326 = vpow2.f32 %v1792_v52  ;;  %v2059_v56 = vpop.f32.mrf.mxu1 }
 0x28d   : > { %v2315_v57 = vpop.eup %2314  ;;  %1551 = vst [vmem:[%s2838_s14 + $0x140] sm:$0xff] %v2313_v55  ;;  %v1793_v58 = vmul.f32 -1.442695, %v1212_v54 }
 0x28e   : > { %v1408_v59 = vadd.f32 1.0, %v2315_v57  ;;  %v1214_v60 = vpop.f32.mrf.mxu1 }
 0x28f   : > { %2328 = vpow2.f32 %v1793_v58 }
 0x290   : > { %v2317_v61 = vpop.eup %2316  ;;  %2330 = vrcp.f32 %v1408_v59  ;;  %v2060_v62 = vpop.f32.mrf.mxu1 }
 0x291   : > { %v2319_v63 = vpop.eup %2318  ;;  %1552 = vst [vmem:[%s2838_s14 + $0x148] sm:$0xff] %v2317_v61 }
 0x292   : > { %v1409_v1 = vadd.f32 1.0, %v2319_v63 }
 0x294   : > { %v2321_v2 = vpop.eup %2320  ;;  %2332 = vrcp.f32 %v1409_v1 }
 0x295   : > { %v2323_v3 = vpop.eup %2322  ;;  %1553 = vst [vmem:[%s2838_s14 + $0x150] sm:$0xff] %v2321_v2 }
 0x296   : > { %v1410_v4 = vadd.f32 1.0, %v2323_v3 }
 0x298   : > { %v2325_v5 = vpop.eup %2324  ;;  %2334 = vrcp.f32 %v1410_v4 }
 0x299   : > { %v2327_v6 = vpop.eup %2326  ;;  %1554 = vst [vmem:[%s2838_s14 + $0x158] sm:$0xff] %v2325_v5 }
 0x29a   : > { %v1411_v7 = vadd.f32 1.0, %v2327_v6 }
 0x29c   : > { %v2329_v8 = vpop.eup %2328  ;;  %2336 = vrcp.f32 %v1411_v7 }
 0x29d   : > { %v2331_v9 = vpop.eup %2330  ;;  %v1412_v30 = vadd.f32 1.0, %v2329_v8 }
 0x29e   : > { %1555 = vst [vmem:[%s2838_s14 + $0x160] sm:$0xff] %v2331_v9 }
 0x29f   : > { %2338 = vrcp.f32 %v1412_v30 }
 0x2a1   : > { %v2333_v10 = vpop.eup %2332 }
 0x2a2   : > { %1556 = vst [vmem:[%s2838_s14 + $0x168] sm:$0xff] %v2333_v10 }
 0x2a5   : > { %v2335_v11 = vpop.eup %2334 }
 0x2a6   : > { %1557 = vst [vmem:[%s2838_s14 + $0x170] sm:$0xff] %v2335_v11 }
 0x2a9   : > { %v2337_v12 = vpop.eup %2336 }
 0x2aa   : > { %1558 = vst [vmem:[%s2838_s14 + $0x178] sm:$0xff] %v2337_v12 }
 0x2ac   : > { %v2339_v13 = vpop.eup %2338 }
 0x2ad   : > { %1559 = vst [vmem:[%s2838_s14 + $0x180] sm:$0xff] %v2339_v13 }
 0x2ae   : > { %2381 = shalt.err (!%p2378_p0)
}
 0x2af   : > { %s2382_s13 = scalar_lea.hbm %s2932_s7, 6272  ;;  %s2386_s11 = scalar_lea.hbm %s2983_s5, 12544 }
 0x2b0   : > { %p2383_p2 = scmp.ne.s32.totalorder %s2932_s7, %s2382_s13  ;;  %p2387_p3 = scmp.lt.s32.totalorder %s2932_s7, %s2983_s5 }
 0x2b1   : > { %p2388_p6 = scmp.lt.s32.totalorder %s2386_s11, %s2382_s13 }
 0x2b2   : > { %p2384_p9 = pnand %p2383_p2, %p2991_p13 }
 0x2b3   : > { %p2389_p11 = por %p2388_p6, %p2387_p3 }
 0x2b4   : > { %p2385_p1 = pneg %p2384_p9 }
 0x2b6   : > { %p2390_p12 = pnand %p2389_p11, %p2385_p1 }
 0x2b8   : > { %2393 = shalt.err (!%p2390_p12)
}
 0x2b9   : > { %s2440_s23 = smov 128   ;;  %s2441_s28 = smov 8  }
 0x2ba   : > { %2065 = dma.vmem_to_hbm [thread:$0]  (%p2991_p13), %s2934_s26, 6272, %s2932_s7, %s1561_s6, %s2440_s23, %s2440_s23, %s2441_s28  }
 0x2bb PF: > { %s1589_s15 = sand.u32 1, %s2420_s18   ;;  %p2992_p4 = scmp.ne.s32.totalorder %s2988_s30, 0 }
 0x2bc   : > { %p2993_p5 = scmp.ge.s32.totalorder %s2432_s21, 2  ;;  %s1590_s8 = scalar_lea.sflag [#allocation4], %s1589_s15 }
 0x2be   : > { %p2072_p7 = pnand %p2993_p5, %p2992_p4 }
 0x2c0   : > { %p2073_p8 = pneg %p2072_p7 }
 0x2c2   : > { %2415 = dma.done.wait (%p2073_p8), %s1590_s8, 6272  }
 0x2c3   : > { %2417 = vsyncadd (%p2073_p8), %s1590_s8, 4294961024  ;;  %p18_p10 = scmp.ge.s32.totalorder %s2497_s24, 4   ;;  %s2994_s18 = smov %s2424_s19 }
 0x2c4   : > { %s2995_s19 = smov %s2428_s20  ;;  %s2996_s20 = smov %s2509_s27 }
 0x2c5   : > { %s2997_s21 = smov %s2497_s24  ;;  %20 = sbr.rel (!%p18_p10) target bundleno = 5 (0x5), region = 88 }
 0x2ca   :  { %1595 = vsyncpa [#allocation3], 1 }
 0x2cb   :  { %1597 = vsyncpa [#allocation3 + $0x1], 1 }
 0x2cc   :  { %1598 = vsyncpa [#allocation4], 1 }
 0x2cd   :  { %1600 = vsyncpa [#allocation4 + $0x1], 1 }

</bundles_post_ra>
